<compile_context>
chip_gen: v7x
topology: tpu7x:2x2x1
jax: 0.10.0
libtpu: 0.0.40
codegen_flags: <defaults>
</compile_context>

<pallas_src>
import functools

import jax
import jax.numpy as jnp
from jax.experimental import pallas as pl
from jax.experimental.pallas import tpu as pltpu


def ncf_kernel(u_ref, i_ref,
               w1_ref, b1_ref,
               w2_ref, b2_ref,
               w3_ref, b3_ref,
               hmlp_ref, hmf_ref, bh_ref,
               out_ref):
    # Gather layout (TB, dim) -> compute layout (dim, TB): upcast + transpose
    # in-kernel (XLU slot has slack; avoids the wrapper-side pad+transpose HBM
    # round trip of the previous version).
    ut = u_ref[...].astype(jnp.float32).T          # (dim, TB) f32
    it = i_ref[...].astype(jnp.float32).T          # (dim, TB) f32

    # Layer 1: Linear(2*dim -> fl) on cat([u, i], dim=1), merged into a single
    # K = 2*dim MXU dot via a sublane concat. bf16 operands, f32 accumulate.
    x1 = jnp.concatenate([ut, it], axis=0).astype(jnp.bfloat16)     # (2*dim, TB)
    h = jnp.dot(w1_ref[...], x1, preferred_element_type=jnp.float32) + b1_ref[...]
    h = jnp.maximum(h, 0.0)                        # Dropout==identity; ReLU (f32 VPU)

    # Layer 2: Linear(fl -> fl//2)
    h = jnp.dot(w2_ref[...], h.astype(jnp.bfloat16),
                preferred_element_type=jnp.float32) + b2_ref[...]
    h = jnp.maximum(h, 0.0)                        # (fl//2, TB)

    # Layer 3: Linear(fl//2 -> fl//4)
    h = jnp.dot(w3_ref[...], h.astype(jnp.bfloat16),
                preferred_element_type=jnp.float32) + b3_ref[...]
    h = jnp.maximum(h, 0.0)                        # (fl//4, TB)

    # MF branch: elementwise product of the SAME uEmbd/iEmbd gathers
    # (the PyTorch forward reuses self.uEmbd / self.iEmbd, not mf_*).
    mf = ut * it                                   # (dim, TB) f32

    # Layer 4 (no activation) folded into the neumf head:
    #   pred = (wn_mlp @ W4) @ h3 + wn_mf @ mf + (wn_mlp @ b4 + bn)
    # Broadcast-mul + sublane reduction -> lane-dense (1, TB) row.
    # TODO(synk): switch these two reductions to 1xK MXU dots if a bundle dump
    # shows the XLU (which now also does the input transposes) is binding.
    pred = (jnp.sum(h * hmlp_ref[...], axis=0, keepdims=True)
            + jnp.sum(mf * hmf_ref[...], axis=0, keepdims=True)
            + bh_ref[...])                         # (1, TB) f32
    out_ref[...] = pred.astype(out_ref.dtype)


def prepare_params(params):
    """One-time conversion of PyTorch-layout params into kernel-ready arrays:
    bf16 MXU weights, f32 biases/head vectors, and the layer-4/neumf fold."""
    dim = params["uEmbd"].shape[1]
    fl4 = params["w4"].shape[0]
    hp = jax.lax.Precision.HIGHEST

    wn = params["wn"].astype(jnp.float32)                   # (1, fl4 + dim)
    wn_mlp, wn_mf = wn[:, :fl4], wn[:, fl4:]                 # cat order: [mlp, mf]

    head_mlp = jnp.matmul(wn_mlp, params["w4"].astype(jnp.float32),
                          precision=hp)                      # (1, fl4)
    bias_head = (jnp.matmul(wn_mlp,
                            params["b4"].astype(jnp.float32).reshape(fl4, 1),
                            precision=hp)
                 + params["bn"].astype(jnp.float32).reshape(1, 1))   # (1, 1)

    return {
        # bf16 embedding tables: halves HBM gather + kernel DMA traffic.
        "emb_u": params["uEmbd"].astype(jnp.bfloat16),
        "emb_i": params["iEmbd"].astype(jnp.bfloat16),
        # bf16 MXU weights (f32 accumulate in-kernel).
        "w1": params["w1"].astype(jnp.bfloat16),             # (fl, 2*dim)
        "w2": params["w2"].astype(jnp.bfloat16),             # (fl//2, fl)
        "w3": params["w3"].astype(jnp.bfloat16),             # (fl//4, fl//2)
        # f32 biases / head vectors (VPU path).
        "b1": params["b1"].astype(jnp.float32).reshape(-1, 1),
        "b2": params["b2"].astype(jnp.float32).reshape(-1, 1),
        "b3": params["b3"].astype(jnp.float32).reshape(-1, 1),
        "head_mlp": head_mlp.reshape(fl4, 1),                # folded layer4 @ neumf
        "head_mf": wn_mf.reshape(dim, 1),
        "bias_head": bias_head,                              # (1, 1)
    }


@functools.partial(jax.jit, static_argnames=("block_b",))
def ncf_forward(user_idx, item_idx, kp, *, block_b=2048):
    """NCF forward. Embedding row-gathers stay XLA glue (contiguous 128 B
    rows); everything downstream runs in one gridded, pipelined Pallas kernel.
    block_b=2048 amortizes per-step overhead while staying well inside the
    default scoped-VMEM limit on all generations; on v7x pick block_b so that
    cdiv(B, block_b) >= 2 (both TensorCores get work)."""
    assert block_b % 128 == 0, "block_b must be a multiple of 128"
    B = user_idx.shape[0]
    nb = pl.cdiv(B, block_b)
    bp = nb * block_b

    # Pad the cheap int32 index vectors (index 0 is always in range) instead
    # of the gathered arrays; padded rows' predictions are sliced off below.
    uidx = jnp.pad(user_idx, (0, bp - B))
    iidx = jnp.pad(item_idx, (0, bp - B))

    u = kp["emb_u"][uidx]                          # (bp, dim) bf16, gather only
    it = kp["emb_i"][iidx]                         # (bp, dim) bf16
    dim = u.shape[1]

    fl = kp["b1"].shape[0]
    fl2 = kp["b2"].shape[0]
    fl4 = kp["b3"].shape[0]

    weights = (kp["w1"], kp["b1"],
               kp["w2"], kp["b2"],
               kp["w3"], kp["b3"],
               kp["head_mlp"], kp["head_mf"], kp["bias_head"])

    emb_spec = pl.BlockSpec((block_b, dim), lambda i: (i, 0))
    const_spec = lambda a: pl.BlockSpec(a.shape, lambda i: (0, 0))   # VMEM-resident

    flops = 2 * bp * (2 * dim * fl + fl * fl2 + fl2 * fl4 + fl4 + 2 * dim)
    bytes_accessed = (2 * bp * dim * 2             # bf16 embedding blocks in
                      + bp * 4                     # f32 predictions out
                      + sum(int(w.size) * w.dtype.itemsize for w in weights))

    out = pl.pallas_call(
        ncf_kernel,
        out_shape=jax.ShapeDtypeStruct((1, bp), jnp.float32),
        grid=(nb,),
        in_specs=[emb_spec, emb_spec] + [const_spec(w) for w in weights],
        out_specs=pl.BlockSpec((1, block_b), lambda i: (0, i)),      # lane-dense
        compiler_params=pltpu.CompilerParams(
            dimension_semantics=("parallel",)),    # 2x on v7x (2 TCs/chip)
        cost_estimate=pl.CostEstimate(flops=flops, transcendentals=0,
                                      bytes_accessed=bytes_accessed),
    )(u, it, *weights)

    return out.reshape(-1)[:B]                     # .flatten() in the PyTorch code


def init_params(key, user_num, item_num, dim=64, first_layer=128):
    """Deterministic parameter init mirroring the PyTorch module's shapes."""
    ks = jax.random.split(key, 16)
    fl = first_layer

    def linear(kw, kb, out_f, in_f):
        bound = 1.0 / jnp.sqrt(in_f)
        w = jax.random.uniform(kw, (out_f, in_f), jnp.float32, -bound, bound)
        b = jax.random.uniform(kb, (out_f,), jnp.float32, -bound, bound)
        return w, b

    params = {}
    params["uEmbd"] = jax.random.normal(ks[0], (user_num, dim), jnp.float32)
    params["iEmbd"] = jax.random.normal(ks[1], (item_num, dim), jnp.float32)
    # mf_uEmbd / mf_iEmbd exist in __init__ but are unused in forward.
    params["mf_uEmbd"] = jax.random.normal(ks[2], (user_num, dim), jnp.float32)
    params["mf_iEmbd"] = jax.random.normal(ks[3], (item_num, dim), jnp.float32)

    params["w1"], params["b1"] = linear(ks[4], ks[5], fl, dim * 2)
    params["w2"], params["b2"] = linear(ks[6], ks[7], fl // 2, fl)
    params["w3"], params["b3"] = linear(ks[8], ks[9], fl // 4, fl // 2)
    params["w4"], params["b4"] = linear(ks[10], ks[11], fl // 4, fl // 4)
    params["wn"], params["bn"] = linear(ks[12], ks[13], 1, dim + fl // 4)
    return params


def ncf_reference(user_idx, item_idx, params):
    """Pure-JAX reference mirroring the PyTorch forward (eval mode), with f32
    weights and the same bf16-quantized embedding values the kernel reads."""
    hp = jax.lax.Precision.HIGHEST
    u = params["uEmbd"].astype(jnp.bfloat16).astype(jnp.float32)[user_idx]
    it = params["iEmbd"].astype(jnp.bfloat16).astype(jnp.float32)[item_idx]
    x = jnp.concatenate([u, it], axis=1)
    h = jnp.maximum(jnp.matmul(x, params["w1"].T, precision=hp) + params["b1"], 0.0)
    h = jnp.maximum(jnp.matmul(h, params["w2"].T, precision=hp) + params["b2"], 0.0)
    h = jnp.maximum(jnp.matmul(h, params["w3"].T, precision=hp) + params["b3"], 0.0)
    h = jnp.matmul(h, params["w4"].T, precision=hp) + params["b4"]
    mf = u * it
    z = jnp.concatenate([h, mf], axis=1)
    return (jnp.matmul(z, params["wn"].T, precision=hp) + params["bn"]).reshape(-1)


if __name__ == "__main__":
    key = jax.random.PRNGKey(0)
    k_param, k_u, k_i = jax.random.split(key, 3)

    user_num, item_num = 200, 300
    dim, first_layer = 64, 128
    batch = 1000                       # non-multiple of block_b -> exercises padding

    params = init_params(k_param, user_num, item_num, dim, first_layer)
    kparams = prepare_params(params)   # one-time weight prep (bf16 + fold + reshapes)

    user_idx = jax.random.randint(k_u, (batch,), 0, user_num)
    item_idx = jax.random.randint(k_i, (batch,), 0, item_num)

    # block_b=512 here so nb=2 (multi-step grid + index padding are exercised);
    # production batches should use the larger default (2048).
    out = ncf_forward(user_idx, item_idx, kparams, block_b=512)
    out = jax.block_until_ready(out)

    ref = ncf_reference(user_idx, item_idx, params)
    assert out.shape == (batch,)
    # Tolerance covers bf16 MLP weights / bf16 activations at the dot
    # boundaries and the (documented) fold of the activation-free layer 4 into
    # the neumf head; the bf16 embedding inputs are bit-identical to the ref.
    assert jnp.allclose(out, ref, atol=2e-2, rtol=2e-2), (
        float(jnp.max(jnp.abs(out - ref))))

    print("KERNEL_OK")
</pallas_src>

<mosaic_0001>
module attributes {stable_mosaic.version = 11 : i64} {
  func.func @ncf_kernel(%arg0: i32, %arg1: memref<512x64xbf16, #tpu.memory_space<vmem>>, %arg2: memref<512x64xbf16, #tpu.memory_space<vmem>>, %arg3: memref<128x128xbf16, #tpu.memory_space<vmem>>, %arg4: memref<128x1xf32, #tpu.memory_space<vmem>>, %arg5: memref<64x128xbf16, #tpu.memory_space<vmem>>, %arg6: memref<64x1xf32, #tpu.memory_space<vmem>>, %arg7: memref<32x64xbf16, #tpu.memory_space<vmem>>, %arg8: memref<32x1xf32, #tpu.memory_space<vmem>>, %arg9: memref<32x1xf32, #tpu.memory_space<vmem>>, %arg10: memref<64x1xf32, #tpu.memory_space<vmem>>, %arg11: memref<1x1xf32, #tpu.memory_space<vmem>>, %arg12: memref<1x512xf32, #tpu.memory_space<vmem>>) attributes {dimension_semantics = [#tpu.dimension_semantics<parallel>], iteration_bounds = array<i64: 2>, scalar_prefetch = 0 : i64, scratch_operands = 0 : i64, tpu.core_type = #tpu.core_type<tc>, window_params = [{transform_indices = @transform_0, window_bounds = array<i64: 512, 64>}, {transform_indices = @transform_1, window_bounds = array<i64: 512, 64>}, {pipeline_mode = #tpu.pipeline_mode<synchronous>, transform_indices = @transform_2, window_bounds = array<i64: 128, 128>}, {pipeline_mode = #tpu.pipeline_mode<synchronous>, transform_indices = @transform_3, window_bounds = array<i64: 128, 1>}, {pipeline_mode = #tpu.pipeline_mode<synchronous>, transform_indices = @transform_4, window_bounds = array<i64: 64, 128>}, {pipeline_mode = #tpu.pipeline_mode<synchronous>, transform_indices = @transform_5, window_bounds = array<i64: 64, 1>}, {pipeline_mode = #tpu.pipeline_mode<synchronous>, transform_indices = @transform_6, window_bounds = array<i64: 32, 64>}, {pipeline_mode = #tpu.pipeline_mode<synchronous>, transform_indices = @transform_7, window_bounds = array<i64: 32, 1>}, {pipeline_mode = #tpu.pipeline_mode<synchronous>, transform_indices = @transform_8, window_bounds = array<i64: 32, 1>}, {pipeline_mode = #tpu.pipeline_mode<synchronous>, transform_indices = @transform_9, window_bounds = array<i64: 64, 1>}, {pipeline_mode = #tpu.pipeline_mode<synchronous>, transform_indices = @transform_10, window_bounds = array<i64: 1, 1>}, {transform_indices = @transform_11, window_bounds = array<i64: 1, 512>}]} {
    %c0 = arith.constant 0 : index
    %c0_0 = arith.constant 0 : index
    %0 = vector.load %arg1[%c0, %c0_0] : memref<512x64xbf16, #tpu.memory_space<vmem>>, vector<512x64xbf16>
    %1 = arith.extf %0 : vector<512x64xbf16> to vector<512x64xf32>
    %2 = tpu.transpose %1, [1, 0] : vector<512x64xf32> -> vector<64x512xf32>
    %c0_1 = arith.constant 0 : index
    %c0_2 = arith.constant 0 : index
    %3 = vector.load %arg2[%c0_1, %c0_2] : memref<512x64xbf16, #tpu.memory_space<vmem>>, vector<512x64xbf16>
    %4 = arith.extf %3 : vector<512x64xbf16> to vector<512x64xf32>
    %5 = tpu.transpose %4, [1, 0] : vector<512x64xf32> -> vector<64x512xf32>
    %6 = tpu.concatenate %2, %5 in 0 : vector<64x512xf32>, vector<64x512xf32> -> vector<128x512xf32>
    %7 = arith.truncf %6 : vector<128x512xf32> to vector<128x512xbf16>
    %c0_3 = arith.constant 0 : index
    %c0_4 = arith.constant 0 : index
    %8 = vector.load %arg3[%c0_3, %c0_4] : memref<128x128xbf16, #tpu.memory_space<vmem>>, vector<128x128xbf16>
    %cst = arith.constant dense<0.000000e+00> : vector<128x512xf32>
    %9 = tpu.matmul %8, %7, %cst {dimension_numbers = #tpu.dot_dimension_numbers<[1], [0], [0], [1], [0, 0, 1, 1], [], []>} : vector<128x128xbf16>, vector<128x512xbf16>, vector<128x512xf32> -> vector<128x512xf32>
    %c0_5 = arith.constant 0 : index
    %c0_6 = arith.constant 0 : index
    %10 = vector.load %arg4[%c0_5, %c0_6] : memref<128x1xf32, #tpu.memory_space<vmem>>, vector<128x1xf32>
    %11 = vector.broadcast %10 : vector<128x1xf32> to vector<128x512xf32>
    %12 = arith.addf %9, %11 : vector<128x512xf32>
    %cst_7 = arith.constant 0.000000e+00 : f32
    %13 = vector.broadcast %cst_7 : f32 to vector<128x512xf32>
    %14 = arith.maximumf %12, %13 : vector<128x512xf32>
    %c0_8 = arith.constant 0 : index
    %c0_9 = arith.constant 0 : index
    %15 = vector.load %arg5[%c0_8, %c0_9] : memref<64x128xbf16, #tpu.memory_space<vmem>>, vector<64x128xbf16>
    %16 = arith.truncf %14 : vector<128x512xf32> to vector<128x512xbf16>
    %cst_10 = arith.constant dense<0.000000e+00> : vector<64x512xf32>
    %17 = tpu.matmul %15, %16, %cst_10 {dimension_numbers = #tpu.dot_dimension_numbers<[1], [0], [0], [1], [0, 0, 1, 1], [], []>} : vector<64x128xbf16>, vector<128x512xbf16>, vector<64x512xf32> -> vector<64x512xf32>
    %c0_11 = arith.constant 0 : index
    %c0_12 = arith.constant 0 : index
    %18 = vector.load %arg6[%c0_11, %c0_12] : memref<64x1xf32, #tpu.memory_space<vmem>>, vector<64x1xf32>
    %19 = vector.broadcast %18 : vector<64x1xf32> to vector<64x512xf32>
    %20 = arith.addf %17, %19 : vector<64x512xf32>
    %cst_13 = arith.constant 0.000000e+00 : f32
    %21 = vector.broadcast %cst_13 : f32 to vector<64x512xf32>
    %22 = arith.maximumf %20, %21 : vector<64x512xf32>
    %c0_14 = arith.constant 0 : index
    %c0_15 = arith.constant 0 : index
    %23 = vector.load %arg7[%c0_14, %c0_15] : memref<32x64xbf16, #tpu.memory_space<vmem>>, vector<32x64xbf16>
    %24 = arith.truncf %22 : vector<64x512xf32> to vector<64x512xbf16>
    %cst_16 = arith.constant dense<0.000000e+00> : vector<32x512xf32>
    %25 = tpu.matmul %23, %24, %cst_16 {dimension_numbers = #tpu.dot_dimension_numbers<[1], [0], [0], [1], [0, 0, 1, 1], [], []>} : vector<32x64xbf16>, vector<64x512xbf16>, vector<32x512xf32> -> vector<32x512xf32>
    %c0_17 = arith.constant 0 : index
    %c0_18 = arith.constant 0 : index
    %26 = vector.load %arg8[%c0_17, %c0_18] : memref<32x1xf32, #tpu.memory_space<vmem>>, vector<32x1xf32>
    %27 = vector.broadcast %26 : vector<32x1xf32> to vector<32x512xf32>
    %28 = arith.addf %25, %27 : vector<32x512xf32>
    %cst_19 = arith.constant 0.000000e+00 : f32
    %29 = vector.broadcast %cst_19 : f32 to vector<32x512xf32>
    %30 = arith.maximumf %28, %29 : vector<32x512xf32>
    %31 = arith.mulf %2, %5 : vector<64x512xf32>
    %c0_20 = arith.constant 0 : index
    %c0_21 = arith.constant 0 : index
    %32 = vector.load %arg9[%c0_20, %c0_21] : memref<32x1xf32, #tpu.memory_space<vmem>>, vector<32x1xf32>
    %33 = vector.broadcast %32 : vector<32x1xf32> to vector<32x512xf32>
    %34 = arith.mulf %30, %33 : vector<32x512xf32>
    %cst_22 = arith.constant dense<0.000000e+00> : vector<512xf32>
    %35 = vector.multi_reduction <add>, %34, %cst_22 [0] : vector<32x512xf32> to vector<512xf32>
    %36 = vector.shape_cast %35 : vector<512xf32> to vector<1x512xf32>
    %c0_23 = arith.constant 0 : index
    %c0_24 = arith.constant 0 : index
    %37 = vector.load %arg10[%c0_23, %c0_24] : memref<64x1xf32, #tpu.memory_space<vmem>>, vector<64x1xf32>
    %38 = vector.broadcast %37 : vector<64x1xf32> to vector<64x512xf32>
    %39 = arith.mulf %31, %38 : vector<64x512xf32>
    %cst_25 = arith.constant dense<0.000000e+00> : vector<512xf32>
    %40 = vector.multi_reduction <add>, %39, %cst_25 [0] : vector<64x512xf32> to vector<512xf32>
    %41 = vector.shape_cast %40 : vector<512xf32> to vector<1x512xf32>
    %42 = arith.addf %36, %41 : vector<1x512xf32>
    %c0_26 = arith.constant 0 : index
    %c0_27 = arith.constant 0 : index
    %43 = vector.load %arg11[%c0_26, %c0_27] : memref<1x1xf32, #tpu.memory_space<vmem>>, vector<1x1xf32>
    %44 = vector.broadcast %43 : vector<1x1xf32> to vector<1x512xf32>
    %45 = arith.addf %42, %44 : vector<1x512xf32>
    %c0_28 = arith.constant 0 : index
    %c0_29 = arith.constant 0 : index
    %46 = vector.load %arg12[%c0_28, %c0_29] : memref<1x512xf32, #tpu.memory_space<vmem>>, vector<1x512xf32>
    tpu.vector_store %arg12[%c0_28, %c0_29], %45 {strides = array<i32>} : memref<1x512xf32, #tpu.memory_space<vmem>>, vector<1x512xf32>,
    return
  }
  func.func @transform_0(%arg0: i32) -> (i32, i32) {
    %c0_i32 = arith.constant 0 : i32
    %c0_i32_0 = arith.constant 0 : i32
    return %arg0, %c0_i32 : i32, i32
  }
  func.func @transform_1(%arg0: i32) -> (i32, i32) {
    %c0_i32 = arith.constant 0 : i32
    %c0_i32_0 = arith.constant 0 : i32
    return %arg0, %c0_i32 : i32, i32
  }
  func.func @transform_2(%arg0: i32) -> (i32, i32) {
    %c0_i32 = arith.constant 0 : i32
    %c0_i32_0 = arith.constant 0 : i32
    %c0_i32_1 = arith.constant 0 : i32
    return %c0_i32, %c0_i32_0 : i32, i32
  }
  func.func @transform_3(%arg0: i32) -> (i32, i32) {
    %c0_i32 = arith.constant 0 : i32
    %c0_i32_0 = arith.constant 0 : i32
    %c0_i32_1 = arith.constant 0 : i32
    return %c0_i32, %c0_i32_0 : i32, i32
  }
  func.func @transform_4(%arg0: i32) -> (i32, i32) {
    %c0_i32 = arith.constant 0 : i32
    %c0_i32_0 = arith.constant 0 : i32
    %c0_i32_1 = arith.constant 0 : i32
    return %c0_i32, %c0_i32_0 : i32, i32
  }
  func.func @transform_5(%arg0: i32) -> (i32, i32) {
    %c0_i32 = arith.constant 0 : i32
    %c0_i32_0 = arith.constant 0 : i32
    %c0_i32_1 = arith.constant 0 : i32
    return %c0_i32, %c0_i32_0 : i32, i32
  }
  func.func @transform_6(%arg0: i32) -> (i32, i32) {
    %c0_i32 = arith.constant 0 : i32
    %c0_i32_0 = arith.constant 0 : i32
    %c0_i32_1 = arith.constant 0 : i32
    return %c0_i32, %c0_i32_0 : i32, i32
  }
  func.func @transform_7(%arg0: i32) -> (i32, i32) {
    %c0_i32 = arith.constant 0 : i32
    %c0_i32_0 = arith.constant 0 : i32
    %c0_i32_1 = arith.constant 0 : i32
    return %c0_i32, %c0_i32_0 : i32, i32
  }
  func.func @transform_8(%arg0: i32) -> (i32, i32) {
    %c0_i32 = arith.constant 0 : i32
    %c0_i32_0 = arith.constant 0 : i32
    %c0_i32_1 = arith.constant 0 : i32
    return %c0_i32, %c0_i32_0 : i32, i32
  }
  func.func @transform_9(%arg0: i32) -> (i32, i32) {
    %c0_i32 = arith.constant 0 : i32
    %c0_i32_0 = arith.constant 0 : i32
    %c0_i32_1 = arith.constant 0 : i32
    return %c0_i32, %c0_i32_0 : i32, i32
  }
  func.func @transform_10(%arg0: i32) -> (i32, i32) {
    %c0_i32 = arith.constant 0 : i32
    %c0_i32_0 = arith.constant 0 : i32
    %c0_i32_1 = arith.constant 0 : i32
    return %c0_i32, %c0_i32_0 : i32, i32
  }
  func.func @transform_11(%arg0: i32) -> (i32, i32) {
    %c0_i32 = arith.constant 0 : i32
    %c0_i32_0 = arith.constant 0 : i32
    return %c0_i32, %arg0 : i32, i32
  }
}

</mosaic_0001>

<bundles_post_ra>
// kernel: ncf_forward.1
= control target key start
LH: loop header
LB: loop body
LE: loop exit
PB: predicated region body
PF: predicated region fallthrough
CT: control target
= control target key end

     0   :  { %s3937_s0 = inlined_call_operand.vmem [shape: bf16[1024,64], index: 0, kind: input, shape index: {}]   ;;  %s3938_s1 = inlined_call_operand.vmem [shape: bf16[1024,64], index: 1, kind: input, shape index: {}]   ;;  %s3939_s2 = inlined_call_operand.vmem [shape: bf16[128,128], index: 2, kind: input, shape index: {}]   ;;  %s3940_s3 = inlined_call_operand.vmem [shape: f32[128,1], index: 3, kind: input, shape index: {}]   ;;  %s3941_s4 = inlined_call_operand.vmem [shape: bf16[64,128], index: 4, kind: input, shape index: {}]   ;;  %s3942_s5 = inlined_call_operand.vmem [shape: f32[64,1], index: 5, kind: input, shape index: {}]   ;;  %s3943_s6 = inlined_call_operand.vmem [shape: bf16[32,64], index: 6, kind: input, shape index: {}]   ;;  %s3944_s7 = inlined_call_operand.vmem [shape: f32[32,1], index: 7, kind: input, shape index: {}]   ;;  %s3945_s8 = inlined_call_operand.vmem [shape: f32[32,1], index: 8, kind: input, shape index: {}]   ;;  %s3946_s9 = inlined_call_operand.vmem [shape: f32[64,1], index: 9, kind: input, shape index: {}]   ;;  %s3947_s10 = inlined_call_operand.<no memory space> [shape: f32[1,1], index: 10, kind: input, shape index: {}]   ;;  %s3948_s11 = inlined_call_operand.hbm [shape: f32[1,1024], index: 11, kind: output, shape index: {}]  }
   0x1   :  { %v16_v0 = vstv %s3947_s10 }
   0x2   :  { %17 = vst [vmem:[#allocation2] sm:$0x1] %v16_v0 }
   0x3   :  { %18 = vsyncpa [#allocation4], 0 }
   0x4   :  { %20 = vsyncpa [#allocation4 + $0x1], 0  ;;  %s3084_s19 = smov 0   ;;  %s3086_s20 = smov 0  }
   0x5   :  { %s3088_s21 = smov 0   ;;  %s3090_s22 = smov 0  }
   0x6 LB: > { %s2257_s10 = sadd.s32 4294967295, %s3016_s22   ;;  %s2258_s23 = sadd.s32 4294967294, %s3016_s22   ;;  %s3016_s22 = sphi %s3090_s22, %s3985_s22   ;;  %s3012_s21 = sphi %s3088_s21, %s3984_s21   ;;  %s3008_s20 = sphi %s3086_s20, %s3983_s20   ;;  %s3004_s19 = sphi %s3084_s19, %s3982_s19  }
   0x7   : > { %s3107_s24 = sadd.s32 1, %s3016_s22   ;;  %s274_s25 = sadd.s32 1, %s3012_s21 }
   0x8   : > { %s271_s26 = ssub.s32 %s3016_s22, %s3107_s24  ;;  %p284_p0 = scmp.ne.s32.totalorder %s3012_s21, %s3008_s20 }
   0x9   : > { %p272_p1 = scmp.eq.s32.totalorder %s271_s26, 0  ;;  %p285_p2 = scmp.eq.s32.totalorder %s2257_s10, 1 }
   0xa   : > { %p290_p3 = scmp.ne.s32.totalorder %s3008_s20, %s3004_s19  ;;  %p291_p4 = scmp.eq.s32.totalorder %s2258_s23, 1 }
   0xb   : > { %s3117_s27 = scalar_select %p272_p1, %s3012_s21, %s274_s25  }
   0xc   : > { %p3119_p5 = por %p285_p2, %p284_p0  ;;  %p3123_p6 = por %p291_p4, %p290_p3 }
   0xd   : > { %p2261_p7 = scmp.ge.s32.totalorder %s3016_s22, 1  ;;  %p354_p8 = scmp.lt.s32.totalorder %s3016_s22, 3 }
   0xf   : > { %p355_p9 = pnand %p2261_p7, %p354_p8 }
  0x11   : > { %358 = sbr.rel (%p355_p9) target bundleno = 1067 (0x42b), region = 64 }
  0x18   : > { %s3129_s30 = sshll.u32 %s2257_s10, 6  ;;  %vm1751_vm0 = vcmask 523264   ;;  %s396_s18 = sand.u32 1, %s3008_s20  }
  0x19   : > { %p400_p10 = scmp.lt.s32.totalorder %s3129_s30, 127  ;;  %s2173_s14 = scalar_lea.sflag [#allocation4], %s396_s18 }
  0x1b   : > { %s3133_s12 = scalar_select %p400_p10, %s3129_s30, 127 }
  0x1d   : > { %s2264_s13 = sshll.u32 %s3133_s12, 2 }
  0x1e   : > { %s3141_s16 = scalar_lea.vmem %s3937_s0, %s2264_s13  ;;  %s3182_s10 = scalar_lea.vmem %s3938_s1, %s2264_s13 }
  0x1f   : > { %v2554_v1 = vld [vmem:[%s3141_s16 + $0x40] sm:$0xff]   ;;  %v2555_v13 = vld [vmem:[%s3141_s16 + $0x48] sm:$0xff]   ;;  %v2556_v31 = vld [vmem:[%s3141_s16 + $0x50] sm:$0xff]   ;;  %s3895_s13 = scalar_lea.hbm %s3948_s11, %s3129_s30 }
  0x20   : > { %v2570_v2 = vld [vmem:[%s3141_s16 + $0xc0] sm:$0xff]   ;;  %v2325_v4 = vunpack.c.l.bf16 %v2554_v1  ;;  %v2326_v8 = vunpack.c.h.bf16 %v2554_v1  ;;  %v2571_v14 = vld [vmem:[%s3141_s16 + $0xc8] sm:$0xff]   ;;  %v2329_v20 = vunpack.c.l.bf16 %v2555_v13  ;;  %v2330_v26 = vunpack.c.h.bf16 %v2555_v13  ;;  %v2572_v32 = vld [vmem:[%s3141_s16 + $0xd0] sm:$0xff]  }
  0x21   : > { %v2292_v3 = vld [vmem:[%s3141_s16] sm:$0xff]   ;;  %v2389_v5 = vunpack.c.l.bf16 %v2570_v2  ;;  %v2390_v10 = vunpack.c.h.bf16 %v2570_v2  ;;  %v2547_v16 = vld [vmem:[%s3141_s16 + $0x8] sm:$0xff]   ;;  %v2393_v21 = vunpack.c.l.bf16 %v2571_v14  ;;  %v2394_v27 = vunpack.c.h.bf16 %v2571_v14  ;;  %v2548_v33 = vld [vmem:[%s3141_s16 + $0x10] sm:$0xff]  }
  0x22   : > { %v2293_v6 = vunpack.c.l.bf16 %v2292_v3  ;;  %v2562_v7 = vld [vmem:[%s3141_s16 + $0x80] sm:$0xff]   ;;  %v2294_v11 = vunpack.c.h.bf16 %v2292_v3  ;;  %v2563_v17 = vld [vmem:[%s3141_s16 + $0x88] sm:$0xff]   ;;  %v2297_v23 = vunpack.c.l.bf16 %v2547_v16  ;;  %v2298_v29 = vunpack.c.h.bf16 %v2547_v16  ;;  %v2564_v34 = vld [vmem:[%s3141_s16 + $0x90] sm:$0xff]  }
  0x23   : > { %v2357_v9 = vunpack.c.l.bf16 %v2562_v7  ;;  %v2358_v12 = vunpack.c.h.bf16 %v2562_v7  ;;  %v2650_v15 = vpack.i.bf16 %v2389_v5, %v2325_v4  ;;  %v2652_v19 = vpack.i.bf16 %v2390_v10, %v2326_v8  ;;  %v2557_v47 = vld [vmem:[%s3141_s16 + $0x58] sm:$0xff]   ;;  %v2558_v63 = vld [vmem:[%s3141_s16 + $0x60] sm:$0xff]   ;;  %v2575_v16 = vld [vmem:[%s3141_s16 + $0xe8] sm:$0xff]  }
  0x24   : > { %v2361_v24 = vunpack.c.l.bf16 %v2563_v17  ;;  %v2654_v25 = vpack.i.bf16 %v2393_v21, %v2329_v20  ;;  %v2362_v30 = vunpack.c.h.bf16 %v2563_v17  ;;  %v2656_v35 = vpack.i.bf16 %v2394_v27, %v2330_v26  ;;  %v2573_v48 = vld [vmem:[%s3141_s16 + $0xd8] sm:$0xff]   ;;  %v2574_v0 = vld [vmem:[%s3141_s16 + $0xe0] sm:$0xff]   ;;  %v2551_v17 = vld [vmem:[%s3141_s16 + $0x28] sm:$0xff]  }
  0x25   : > { %v2722_v18 = vpack.i.bf16 %v2357_v9, %v2293_v6  ;;  %2651 = vxpose.xlu0.b32.start [1/16] (narrow) %v2650_v15, 64  ;;  %v2724_v22 = vpack.i.bf16 %v2358_v12, %v2294_v11  ;;  %v2333_v36 = vunpack.c.l.bf16 %v2556_v31  ;;  %v2397_v37 = vunpack.c.l.bf16 %v2572_v32  ;;  %v2549_v49 = vld [vmem:[%s3141_s16 + $0x18] sm:$0xff]   ;;  %v2550_v1 = vld [vmem:[%s3141_s16 + $0x20] sm:$0xff]   ;;  %v2559_v15 = vld [vmem:[%s3141_s16 + $0x68] sm:$0xff]  }
  0x26   : > { %v2726_v28 = vpack.i.bf16 %v2361_v24, %v2297_v23  ;;  %v2728_v38 = vpack.i.bf16 %v2362_v30, %v2298_v29  ;;  %v2301_v39 = vunpack.c.l.bf16 %v2548_v33  ;;  %v2365_v40 = vunpack.c.l.bf16 %v2564_v34  ;;  %v2565_v50 = vld [vmem:[%s3141_s16 + $0x98] sm:$0xff]   ;;  %v2566_v2 = vld [vmem:[%s3141_s16 + $0xa0] sm:$0xff]  }
  0x27   : > { %2723 = vxpose.xlu1.b32.start [1/16] (narrow) %v2722_v18, 64  ;;  %v2658_v41 = vpack.i.bf16 %v2397_v37, %v2333_v36  ;;  %v2334_v42 = vunpack.c.h.bf16 %v2556_v31  ;;  %v2398_v43 = vunpack.c.h.bf16 %v2572_v32  ;;  %v2302_v45 = vunpack.c.h.bf16 %v2548_v33  ;;  %v2567_v18 = vld [vmem:[%s3141_s16 + $0xa8] sm:$0xff]   ;;  %v2560_v31 = vld [vmem:[%s3141_s16 + $0x70] sm:$0xff]  }
  0x28   : > { %v2730_v44 = vpack.i.bf16 %v2365_v40, %v2301_v39  ;;  %v2366_v46 = vunpack.c.h.bf16 %v2564_v34  ;;  %v2337_v52 = vunpack.c.l.bf16 %v2557_v47  ;;  %v2401_v53 = vunpack.c.l.bf16 %v2573_v48  ;;  %v2576_v32 = vld [vmem:[%s3141_s16 + $0xf0] sm:$0xff]  }
  0x29   : > { %2653 = vxpose.xlu0.b32.cont [2/16] (narrow) %v2652_v19, 64  ;;  %v2660_v51 = vpack.i.bf16 %v2398_v43, %v2334_v42  ;;  %v2305_v55 = vunpack.c.l.bf16 %v2549_v49  ;;  %v2369_v56 = vunpack.c.l.bf16 %v2565_v50  ;;  %v2338_v58 = vunpack.c.h.bf16 %v2557_v47  ;;  %v2552_v33 = vld [vmem:[%s3141_s16 + $0x30] sm:$0xff]  }
  0x2a   : > { %v2732_v54 = vpack.i.bf16 %v2366_v46, %v2302_v45  ;;  %v2662_v57 = vpack.i.bf16 %v2401_v53, %v2337_v52  ;;  %v2402_v59 = vunpack.c.h.bf16 %v2573_v48  ;;  %v2306_v61 = vunpack.c.h.bf16 %v2549_v49  ;;  %v2568_v34 = vld [vmem:[%s3141_s16 + $0xb0] sm:$0xff]   ;;  %v2561_v48 = vld [vmem:[%s3141_s16 + $0x78] sm:$0xff]  }
  0x2b   : > { %2725 = vxpose.xlu1.b32.cont [2/16] (narrow) %v2724_v22, 64  ;;  %v2734_v60 = vpack.i.bf16 %v2369_v56, %v2305_v55  ;;  %v2370_v62 = vunpack.c.h.bf16 %v2565_v50  ;;  %v2341_v4 = vunpack.c.l.bf16 %v2558_v63  ;;  %v2405_v5 = vunpack.c.l.bf16 %v2574_v0  ;;  %v2577_v49 = vld [vmem:[%s3141_s16 + $0xf8] sm:$0xff]  }
  0x2c   : > { %v2664_v3 = vpack.i.bf16 %v2402_v59, %v2338_v58  ;;  %v2309_v7 = vunpack.c.l.bf16 %v2550_v1  ;;  %v2373_v8 = vunpack.c.l.bf16 %v2566_v2  ;;  %v2342_v10 = vunpack.c.h.bf16 %v2558_v63  ;;  %v2553_v50 = vld [vmem:[%s3141_s16 + $0x38] sm:$0xff]  }
  0x2d   : > { %2655 = vxpose.xlu0.b32.cont [3/16] (narrow) %v2654_v25, 64  ;;  %v2736_v6 = vpack.i.bf16 %v2370_v62, %v2306_v61  ;;  %v2666_v9 = vpack.i.bf16 %v2405_v5, %v2341_v4  ;;  %v2406_v11 = vunpack.c.h.bf16 %v2574_v0  ;;  %v2310_v13 = vunpack.c.h.bf16 %v2550_v1  ;;  %v2585_v0 = vld [vmem:[%s3182_s10 + $0x40] sm:$0xff]  }
  0x2e   : > { %v2738_v12 = vpack.i.bf16 %v2373_v8, %v2309_v7  ;;  %v2374_v14 = vunpack.c.h.bf16 %v2566_v2  ;;  %v2345_v20 = vunpack.c.l.bf16 %v2559_v15  ;;  %v2409_v21 = vunpack.c.l.bf16 %v2575_v16  ;;  %v2601_v1 = vld [vmem:[%s3182_s10 + $0xc0] sm:$0xff]  }
  0x2f   : > { %2727 = vxpose.xlu1.b32.cont [3/16] (narrow) %v2726_v28, 64  ;;  %v2668_v19 = vpack.i.bf16 %v2406_v11, %v2342_v10  ;;  %v2313_v23 = vunpack.c.l.bf16 %v2551_v17  ;;  %v2377_v24 = vunpack.c.l.bf16 %v2567_v18  ;;  %v2346_v26 = vunpack.c.h.bf16 %v2559_v15  ;;  %v2420_v2 = vld [vmem:[%s3182_s10] sm:$0xff]  }
  0x30   : > { %v2740_v22 = vpack.i.bf16 %v2374_v14, %v2310_v13  ;;  %v2670_v25 = vpack.i.bf16 %v2409_v21, %v2345_v20  ;;  %v2410_v27 = vunpack.c.h.bf16 %v2575_v16  ;;  %v2314_v29 = vunpack.c.h.bf16 %v2551_v17  ;;  %v2586_v16 = vld [vmem:[%s3182_s10 + $0x48] sm:$0xff]  }
  0x31   : > { %2657 = vxpose.xlu0.b32.cont [4/16] (narrow) %v2656_v35, 64  ;;  %v2742_v28 = vpack.i.bf16 %v2377_v24, %v2313_v23  ;;  %v2378_v30 = vunpack.c.h.bf16 %v2567_v18  ;;  %v2349_v36 = vunpack.c.l.bf16 %v2560_v31  ;;  %v2413_v37 = vunpack.c.l.bf16 %v2576_v32  ;;  %v2602_v17 = vld [vmem:[%s3182_s10 + $0xc8] sm:$0xff]  }
  0x32   : > { %v2672_v35 = vpack.i.bf16 %v2410_v27, %v2346_v26  ;;  %v2317_v39 = vunpack.c.l.bf16 %v2552_v33  ;;  %v2381_v40 = vunpack.c.l.bf16 %v2568_v34  ;;  %v2350_v42 = vunpack.c.h.bf16 %v2560_v31  ;;  %v2578_v18 = vld [vmem:[%s3182_s10 + $0x8] sm:$0xff]  }
  0x33   : > { %2729 = vxpose.xlu1.b32.cont [4/16] (narrow) %v2728_v38, 64  ;;  %v2744_v38 = vpack.i.bf16 %v2378_v30, %v2314_v29  ;;  %v2414_v43 = vunpack.c.h.bf16 %v2576_v32  ;;  %v2318_v46 = vunpack.c.h.bf16 %v2552_v33  ;;  %v2382_v47 = vunpack.c.h.bf16 %v2568_v34  ;;  %v2587_v32 = vld [vmem:[%s3182_s10 + $0x50] sm:$0xff]  }
  0x34   : > { %v2746_v45 = vpack.i.bf16 %v2381_v40, %v2317_v39  ;;  %v2353_v53 = vunpack.c.l.bf16 %v2561_v48  ;;  %v2321_v56 = vunpack.c.l.bf16 %v2553_v50  ;;  %v2354_v59 = vunpack.c.h.bf16 %v2561_v48  ;;  %v2603_v33 = vld [vmem:[%s3182_s10 + $0xd0] sm:$0xff]  }
  0x35   : > { %2659 = vxpose.xlu0.b32.cont [5/16] (narrow) %v2658_v41, 64  ;;  %v2674_v41 = vpack.i.bf16 %v2413_v37, %v2349_v36  ;;  %v2676_v52 = vpack.i.bf16 %v2414_v43, %v2350_v42  ;;  %v2748_v55 = vpack.i.bf16 %v2382_v47, %v2318_v46  ;;  %v2322_v62 = vunpack.c.h.bf16 %v2553_v50  ;;  %v2579_v34 = vld [vmem:[%s3182_s10 + $0x10] sm:$0xff]   ;;  %v2604_v50 = vld [vmem:[%s3182_s10 + $0xd8] sm:$0xff]  }
  0x36   : > { %v2453_v5 = vunpack.c.l.bf16 %v2585_v0  ;;  %v2421_v8 = vunpack.c.l.bf16 %v2420_v2  ;;  %v2454_v10 = vunpack.c.h.bf16 %v2585_v0  ;;  %v2518_v11 = vunpack.c.h.bf16 %v2601_v1 }
  0x37   : > { %2731 = vxpose.xlu1.b32.cont [5/16] (narrow) %v2730_v44, 64  ;;  %v3949_v44 = vmov 0   ;;  %v2422_v13 = vunpack.c.h.bf16 %v2420_v2  ;;  %v2457_v21 = vunpack.c.l.bf16 %v2586_v16  ;;  %v2425_v24 = vunpack.c.l.bf16 %v2578_v18  ;;  %v2605_v2 = vld [vmem:[%s3182_s10 + $0xe0] sm:$0xff]  }
  0x38   : > { %1149 = vmatprep.mubr.bf16.mxu0 %v3949_v44  ;;  %1262 = vmatprep.mubr.bf16.mxu1 %v3949_v44  ;;  %v2796_v20 = vpack.i.bf16 %v2518_v11, %v2454_v10  ;;  %v2458_v27 = vunpack.c.h.bf16 %v2586_v16  ;;  %v2426_v30 = vunpack.c.h.bf16 %v2578_v18  ;;  %v2461_v37 = vunpack.c.l.bf16 %v2587_v32  ;;  %v2606_v18 = vld [vmem:[%s3182_s10 + $0xe8] sm:$0xff]  }
  0x39   : > { %2661 = vxpose.xlu0.b32.cont [6/16] (narrow) %v2660_v51, 64  ;;  %v2569_v51 = vld [vmem:[%s3141_s16 + $0xb8] sm:$0xff]   ;;  %v2429_v40 = vunpack.c.l.bf16 %v2579_v34  ;;  %v2462_v43 = vunpack.c.h.bf16 %v2587_v32  ;;  %v2430_v47 = vunpack.c.h.bf16 %v2579_v34  ;;  %v2607_v34 = vld [vmem:[%s3182_s10 + $0xf0] sm:$0xff]   ;;  %s3020_s16 = smov [#allocation3]  }
  0x3a   : > { %v2386_v63 = vunpack.c.h.bf16 %v2569_v51  ;;  %s2958_s17 = sshll.u32 %s3020_s16, 4  ;;  %s2959_s17 = int_to_ptr.vmem [resolvable:$false] %s2958_s17 }
  0x3b   : > { %2733 = vxpose.xlu1.b32.cont [6/16] (narrow) %v2732_v54, 64  ;;  %v2417_v54 = vunpack.c.l.bf16 %v2577_v49 }
  0x3c   : > { %v2752_v7 = vpack.i.bf16 %v2386_v63, %v2322_v62 }
  0x3d   : > { %2663 = vxpose.xlu0.b32.cont [7/16] (narrow) %v2662_v57, 64  ;;  %v2385_v57 = vunpack.c.l.bf16 %v2569_v51  ;;  %v2678_v58 = vpack.i.bf16 %v2417_v54, %v2353_v53  ;;  %v2580_v51 = vld [vmem:[%s3182_s10 + $0x18] sm:$0xff]  }
  0x3e   : > { %v2434_v63 = vunpack.c.h.bf16 %v2580_v51 }
  0x3f   : > { %2735 = vxpose.xlu1.b32.cont [7/16] (narrow) %v2734_v60, 64  ;;  %v2418_v60 = vunpack.c.h.bf16 %v2577_v49  ;;  %v2750_v61 = vpack.i.bf16 %v2385_v57, %v2321_v56  ;;  %v2588_v49 = vld [vmem:[%s3182_s10 + $0x58] sm:$0xff]   ;;  %v2433_v57 = vunpack.c.l.bf16 %v2580_v51 }
  0x40   : > { %v2465_v54 = vunpack.c.l.bf16 %v2588_v49  ;;  %v2608_v51 = vld [vmem:[%s3182_s10 + $0xf8] sm:$0xff]  }
  0x41   : > { %2665 = vxpose.xlu0.b32.cont [8/16] (narrow) %v2664_v3, 64  ;;  %v2593_v3 = vld [vmem:[%s3182_s10 + $0x80] sm:$0xff]   ;;  %v2680_v4 = vpack.i.bf16 %v2418_v60, %v2354_v59  ;;  %v2466_v60 = vunpack.c.h.bf16 %v2588_v49 }
  0x42   : > { %v2486_v14 = vunpack.c.h.bf16 %v2593_v3 }
  0x43   : > { %2737 = vxpose.xlu1.b32.cont [8/16] (narrow) %v2736_v6, 64  ;;  %v2517_v6 = vunpack.c.l.bf16 %v2601_v1  ;;  %v2589_v1 = vld [vmem:[%s3182_s10 + $0x60] sm:$0xff]  }
  0x44   : > { %v2868_v23 = vpack.i.bf16 %v2486_v14, %v2422_v13  ;;  %v2534_v13 = vunpack.c.h.bf16 %v2605_v2 }
  0x45   : > { %2667 = vxpose.xlu0.b32.cont [9/16] (narrow) %v2666_v9, 64  ;;  %v2485_v9 = vunpack.c.l.bf16 %v2593_v3  ;;  %v2581_v3 = vld [vmem:[%s3182_s10 + $0x20] sm:$0xff]  }
  0x47   : > { %2739 = vxpose.xlu1.b32.cont [9/16] (narrow) %v2738_v12, 64  ;;  %v2794_v12 = vpack.i.bf16 %v2517_v6, %v2453_v5  ;;  %v2866_v15 = vpack.i.bf16 %v2485_v9, %v2421_v8  ;;  %v2469_v6 = vunpack.c.l.bf16 %v2589_v1  ;;  %v2437_v9 = vunpack.c.l.bf16 %v2581_v3 }
  0x49   : > { %2669 = vxpose.xlu0.b32.cont [10/16] (narrow) %v2668_v19, 64  ;;  %v2594_v19 = vld [vmem:[%s3182_s10 + $0x88] sm:$0xff]  }
  0x4a   : > { %v2490_v31 = vunpack.c.h.bf16 %v2594_v19 }
  0x4b   : > { %2741 = vxpose.xlu1.b32.cont [10/16] (narrow) %v2740_v22, 64  ;;  %v2521_v22 = vunpack.c.l.bf16 %v2602_v17 }
  0x4c   : > { %v2872_v39 = vpack.i.bf16 %v2490_v31, %v2426_v30 }
  0x4d   : > { %2671 = vxpose.xlu0.b32.cont [11/16] (narrow) %v2670_v25, 64  ;;  %v2489_v25 = vunpack.c.l.bf16 %v2594_v19  ;;  %v2798_v26 = vpack.i.bf16 %v2521_v22, %v2457_v21  ;;  %v2582_v19 = vld [vmem:[%s3182_s10 + $0x28] sm:$0xff]  }
  0x4e   : > { %v2442_v31 = vunpack.c.h.bf16 %v2582_v19 }
  0x4f   : > { %2743 = vxpose.xlu1.b32.cont [11/16] (narrow) %v2742_v28, 64  ;;  %v2522_v28 = vunpack.c.h.bf16 %v2602_v17  ;;  %v2870_v29 = vpack.i.bf16 %v2489_v25, %v2425_v24  ;;  %v2590_v17 = vld [vmem:[%s3182_s10 + $0x68] sm:$0xff]   ;;  %v2441_v25 = vunpack.c.l.bf16 %v2582_v19 }
  0x50   : > { %v2473_v22 = vunpack.c.l.bf16 %v2590_v17 }
  0x51   : > { %2673 = vxpose.xlu0.b32.cont [12/16] (narrow) %v2672_v35, 64  ;;  %v2595_v35 = vld [vmem:[%s3182_s10 + $0x90] sm:$0xff]   ;;  %v2800_v36 = vpack.i.bf16 %v2522_v28, %v2458_v27  ;;  %v2474_v28 = vunpack.c.h.bf16 %v2590_v17 }
  0x52   : > { %v2494_v48 = vunpack.c.h.bf16 %v2595_v35 }
  0x53   : > { %2745 = vxpose.xlu1.b32.cont [12/16] (narrow) %v2744_v38, 64  ;;  %v2525_v38 = vunpack.c.l.bf16 %v2603_v33 }
  0x54   : > { %v2876_v56 = vpack.i.bf16 %v2494_v48, %v2430_v47 }
  0x55   : > { %2675 = vxpose.xlu0.b32.cont [13/16] (narrow) %v2674_v41, 64  ;;  %v2493_v41 = vunpack.c.l.bf16 %v2595_v35  ;;  %v2802_v42 = vpack.i.bf16 %v2525_v38, %v2461_v37  ;;  %v2583_v35 = vld [vmem:[%s3182_s10 + $0x30] sm:$0xff]  }
  0x56   : > { %v2446_v48 = vunpack.c.h.bf16 %v2583_v35 }
  0x57   : > { %2747 = vxpose.xlu1.b32.cont [13/16] (narrow) %v2746_v45, 64  ;;  %v2526_v45 = vunpack.c.h.bf16 %v2603_v33  ;;  %v2874_v46 = vpack.i.bf16 %v2493_v41, %v2429_v40  ;;  %v2591_v33 = vld [vmem:[%s3182_s10 + $0x70] sm:$0xff]   ;;  %v2445_v41 = vunpack.c.l.bf16 %v2583_v35 }
  0x58   : > { %v2477_v38 = vunpack.c.l.bf16 %v2591_v33 }
  0x59   : > { %2677 = vxpose.xlu0.b32.cont [14/16] (narrow) %v2676_v52, 64  ;;  %v2596_v52 = vld [vmem:[%s3182_s10 + $0x98] sm:$0xff]   ;;  %v2804_v53 = vpack.i.bf16 %v2526_v45, %v2462_v43  ;;  %v2478_v45 = vunpack.c.h.bf16 %v2591_v33 }
  0x5a   : > { %v2498_v0 = vunpack.c.h.bf16 %v2596_v52 }
  0x5b   : > { %2749 = vxpose.xlu1.b32.cont [14/16] (narrow) %v2748_v55, 64  ;;  %v2529_v55 = vunpack.c.l.bf16 %v2604_v50 }
  0x5c   : > { %v2880_v8 = vpack.i.bf16 %v2498_v0, %v2434_v63 }
  0x5d   : > { %2679 = vxpose.xlu0.b32.cont [15/16] (narrow) %v2678_v58, 64  ;;  %v2497_v58 = vunpack.c.l.bf16 %v2596_v52  ;;  %v2806_v59 = vpack.i.bf16 %v2529_v55, %v2465_v54  ;;  %v2584_v52 = vld [vmem:[%s3182_s10 + $0x38] sm:$0xff]  }
  0x5e   : > { %v2450_v0 = vunpack.c.h.bf16 %v2584_v52 }
  0x5f   : > { %2751 = vxpose.xlu1.b32.cont [15/16] (narrow) %v2750_v61, 64  ;;  %v2530_v61 = vunpack.c.h.bf16 %v2604_v50  ;;  %v2878_v62 = vpack.i.bf16 %v2497_v58, %v2433_v57  ;;  %v2592_v50 = vld [vmem:[%s3182_s10 + $0x78] sm:$0xff]   ;;  %v2449_v58 = vunpack.c.l.bf16 %v2584_v52 }
  0x60   : > { %v2481_v55 = vunpack.c.l.bf16 %v2592_v50 }
  0x61   : > { %2681 = vxpose.xlu0.b32.end [16/16] (narrow) %v2680_v4, 64  ;;  %v2597_v4 = vld [vmem:[%s3182_s10 + $0xa0] sm:$0xff]   ;;  %v2808_v5 = vpack.i.bf16 %v2530_v61, %v2466_v60  ;;  %v2482_v61 = vunpack.c.h.bf16 %v2592_v50 }
  0x62   : > { %v2501_v10 = vunpack.c.l.bf16 %v2597_v4  ;;  %v2502_v16 = vunpack.c.h.bf16 %v2597_v4 }
  0x63   : > { %2753 = vxpose.xlu1.b32.end [16/16] (narrow) %v2752_v7, 64  ;;  %v2533_v7 = vunpack.c.l.bf16 %v2605_v2 }
  0x64   : > { %v2882_v14 = vpack.i.bf16 %v2501_v10, %v2437_v9 }
  0x65   : > { %2795 = vxpose.xlu0.b32.start [1/16] (narrow) %v2794_v12, 64  ;;  %v2810_v11 = vpack.i.bf16 %v2533_v7, %v2469_v6  ;;  %v2470_v12 = vunpack.c.h.bf16 %v2589_v1 }
  0x67   : > { %2867 = vxpose.xlu1.b32.start [1/16] (narrow) %v2866_v15, 64  ;;  %v2438_v15 = vunpack.c.h.bf16 %v2581_v3  ;;  %v2812_v21 = vpack.i.bf16 %v2534_v13, %v2470_v12 }
  0x69   : > { %2797 = vxpose.xlu0.b32.cont [2/16] (narrow) %v2796_v20, 64  ;;  %v2598_v20 = vld [vmem:[%s3182_s10 + $0xa8] sm:$0xff]   ;;  %v2884_v24 = vpack.i.bf16 %v2502_v16, %v2438_v15 }
  0x6a   : > { %v2506_v32 = vunpack.c.h.bf16 %v2598_v20 }
  0x6b   : > { %2869 = vxpose.xlu1.b32.cont [2/16] (narrow) %v2868_v23, 64  ;;  %v2537_v23 = vunpack.c.l.bf16 %v2606_v18 }
  0x6c   : > { %v2888_v40 = vpack.i.bf16 %v2506_v32, %v2442_v31 }
  0x6d   : > { %2799 = vxpose.xlu0.b32.cont [3/16] (narrow) %v2798_v26, 64  ;;  %v2505_v26 = vunpack.c.l.bf16 %v2598_v20  ;;  %v2814_v27 = vpack.i.bf16 %v2537_v23, %v2473_v22 }
  0x6f   : > { %2871 = vxpose.xlu1.b32.cont [3/16] (narrow) %v2870_v29, 64  ;;  %v2538_v29 = vunpack.c.h.bf16 %v2606_v18  ;;  %v2886_v30 = vpack.i.bf16 %v2505_v26, %v2441_v25 }
  0x71   : > { %2801 = vxpose.xlu0.b32.cont [4/16] (narrow) %v2800_v36, 64  ;;  %v2599_v36 = vld [vmem:[%s3182_s10 + $0xb0] sm:$0xff]   ;;  %v2816_v37 = vpack.i.bf16 %v2538_v29, %v2474_v28 }
  0x72   : > { %v2510_v49 = vunpack.c.h.bf16 %v2599_v36 }
  0x73   : > { %2873 = vxpose.xlu1.b32.cont [4/16] (narrow) %v2872_v39, 64  ;;  %v2541_v39 = vunpack.c.l.bf16 %v2607_v34 }
  0x74   : > { %v2892_v57 = vpack.i.bf16 %v2510_v49, %v2446_v48 }
  0x75   : > { %2803 = vxpose.xlu0.b32.cont [5/16] (narrow) %v2802_v42, 64  ;;  %v2509_v42 = vunpack.c.l.bf16 %v2599_v36  ;;  %v2818_v43 = vpack.i.bf16 %v2541_v39, %v2477_v38 }
  0x77   : > { %2875 = vxpose.xlu1.b32.cont [5/16] (narrow) %v2874_v46, 64  ;;  %v2542_v46 = vunpack.c.h.bf16 %v2607_v34  ;;  %v2890_v47 = vpack.i.bf16 %v2509_v42, %v2445_v41 }
  0x79   : > { %2805 = vxpose.xlu0.b32.cont [6/16] (narrow) %v2804_v53, 64  ;;  %v2600_v53 = vld [vmem:[%s3182_s10 + $0xb8] sm:$0xff]   ;;  %v2820_v54 = vpack.i.bf16 %v2542_v46, %v2478_v45  ;;  %s2262_s10 = sshll.u32 %s396_s18, 2 }
  0x7a   : > { %v2514_v1 = vunpack.c.h.bf16 %v2600_v53  ;;  %s398_s23 = scalar_lea.vmem [#allocation3], %s2262_s10  ;;  %s2960_s10 = scalar_lea.vmem %s2959_s17, 128 }
  0x7b   : > { %2877 = vxpose.xlu1.b32.cont [6/16] (narrow) %v2876_v56, 64  ;;  %v2545_v56 = vunpack.c.l.bf16 %v2608_v51  ;;  %s2187_s25 = sshll.u32 %s398_s23, 4  ;;  %s3897_s25 = int_to_ptr.vmem [resolvable:$true] %s2187_s25 }
  0x7c   : > { %v2896_v3 = vpack.i.bf16 %v2514_v1, %v2450_v0  ;;  %s2954_s15 = scalar_lea.vmem %s3897_s25, 64  ;;  %p2961_p0 = scmp.lt.s32.totalorder %s3897_s25, %s2959_s17 }
  0x7d   : > { %2807 = vxpose.xlu0.b32.cont [7/16] (narrow) %v2806_v59, 64  ;;  %v2513_v59 = vunpack.c.l.bf16 %v2600_v53  ;;  %v2822_v60 = vpack.i.bf16 %v2545_v56, %v2481_v55  ;;  %p2955_p11 = scmp.ne.s32.totalorder %s3897_s25, %s2954_s15  ;;  %p2962_p1 = scmp.lt.s32.totalorder %s2960_s10, %s2954_s15 }
  0x7f   : > { %2879 = vxpose.xlu1.b32.cont [7/16] (narrow) %v2878_v62, 64  ;;  %v2546_v62 = vunpack.c.h.bf16 %v2608_v51  ;;  %v2894_v63 = vpack.i.bf16 %v2513_v59, %v2449_v58  ;;  %p2956_p12 = pnand %p2955_p11, %p3119_p5  ;;  %p2963_p2 = por %p2962_p1, %p2961_p0 }
  0x81   : > { %2809 = vxpose.xlu0.b32.cont [8/16] (narrow) %v2808_v5, 64  ;;  %v2824_v2 = vpack.i.bf16 %v2546_v62, %v2482_v61  ;;  %v975_v61 = vld [vmem:[%s3940_s3 + $0x10] sm:$0xff]  ;;  %p2957_p13 = pneg %p2956_p12 }
  0x83   : > { %2881 = vxpose.xlu1.b32.cont [8/16] (narrow) %v2880_v8, 64  ;;  %p2964_p3 = pnand %p2963_p2, %p2957_p13 }
  0x85   : > { %2811 = vxpose.xlu0.b32.cont [9/16] (narrow) %v2810_v11, 64 }
  0x87   : > { %2883 = vxpose.xlu1.b32.cont [9/16] (narrow) %v2882_v14, 64 }
  0x89   : > { %2813 = vxpose.xlu0.b32.cont [10/16] (narrow) %v2812_v21, 64 }
  0x8b   : > { %2885 = vxpose.xlu1.b32.cont [10/16] (narrow) %v2884_v24, 64 }
  0x8d   : > { %2815 = vxpose.xlu0.b32.cont [11/16] (narrow) %v2814_v27, 64 }
  0x8f   : > { %2887 = vxpose.xlu1.b32.cont [11/16] (narrow) %v2886_v30, 64 }
  0x91   : > { %2817 = vxpose.xlu0.b32.cont [12/16] (narrow) %v2816_v37, 64 }
  0x93   : > { %2889 = vxpose.xlu1.b32.cont [12/16] (narrow) %v2888_v40, 64 }
  0x95   : > { %2819 = vxpose.xlu0.b32.cont [13/16] (narrow) %v2818_v43, 64 }
  0x97   : > { %2891 = vxpose.xlu1.b32.cont [13/16] (narrow) %v2890_v47, 64 }
  0x99   : > { %2821 = vxpose.xlu0.b32.cont [14/16] (narrow) %v2820_v54, 64  ;;  %v974_v54 = vld [vmem:[%s3940_s3 + $0x8] sm:$0xff] }
  0x9b   : > { %2893 = vxpose.xlu1.b32.cont [14/16] (narrow) %v2892_v57, 64 }
  0x9d   : > { %2823 = vxpose.xlu0.b32.cont [15/16] (narrow) %v2822_v60, 64 }
  0x9f   : > { %2895 = vxpose.xlu1.b32.cont [15/16] (narrow) %v2894_v63, 64 }
  0xa1   : > { %2825 = vxpose.xlu0.b32.end [16/16] (narrow) %v2824_v2, 64 }
  0xa3   : > { %2897 = vxpose.xlu1.b32.end [16/16] (narrow) %v2896_v3, 64 }
  0xa5   : > { %v3216_v4 = vpop.trf.xlu0 }
  0xa6   : > { %v2683_v6 = vunpack.i.l.bf16 %v3216_v4  ;;  %v2686_v7 = vunpack.i.h.bf16 %v3216_v4 }
  0xa7   : > { %v3218_v5 = vpop.trf.xlu1 }
  0xa8   : > { %v2755_v9 = vunpack.i.l.bf16 %v3218_v5  ;;  %v2758_v10 = vunpack.i.h.bf16 %v3218_v5 }
  0xa9   : > { %v3222_v8 = vpop.trf.xlu0 }
  0xaa   : > { %v2688_v12 = vunpack.i.l.bf16 %v3222_v8  ;;  %v2691_v13 = vunpack.i.h.bf16 %v3222_v8  ;;  %v1453_v8 = vld [vmem:[%s3942_s5 + $0x30] sm:$0xff] }
  0xab   : > { %v3226_v11 = vpop.trf.xlu1 }
  0xac   : > { %v2760_v14 = vunpack.i.l.bf16 %v3226_v11  ;;  %v2763_v15 = vunpack.i.h.bf16 %v3226_v11  ;;  %v926_v16 = vpack.c.bf16 %v2688_v12, %v2683_v6  ;;  %v928_v17 = vpack.c.bf16 %v2691_v13, %v2686_v7  ;;  %v1454_v11 = vld [vmem:[%s3942_s5 + $0x38] sm:$0xff] }
  0xad   : > { %v3240_v18 = vpop.trf.xlu0 }
  0xae   : > { %v925_v19 = vpack.c.bf16 %v2760_v14, %v2755_v9  ;;  %v927_v20 = vpack.c.bf16 %v2763_v15, %v2758_v10  ;;  %1117 = vmatprep.subr.bf16.mxu0 %v926_v16  ;;  %1230 = vmatprep.subr.bf16.mxu1 %v928_v17  ;;  %v2696_v22 = vunpack.i.h.bf16 %v3240_v18  ;;  %v2693_v23 = vunpack.i.l.bf16 %v3240_v18 }
  0xaf   : > { %v3250_v21 = vpop.trf.xlu1 }
  0xb0   : > { %1118 = vmatpush1.bf16.msra.mxu0 %v925_v19  ;;  %1231 = vmatpush1.bf16.msra.mxu1 %v927_v20  ;;  %v2768_v24 = vunpack.i.h.bf16 %v3250_v21  ;;  %v2765_v25 = vunpack.i.l.bf16 %v3250_v21  ;;  %v976_v20 = vld [vmem:[%s3940_s3 + $0x18] sm:$0xff] }
  0xb1   : > { %v3256_v26 = vpop.trf.xlu0 }
  0xb2   : > { %v2701_v27 = vunpack.i.h.bf16 %v3256_v26  ;;  %v2698_v28 = vunpack.i.l.bf16 %v3256_v26  ;;  %v1990_v26 = vld [vmem:[%s3946_s9 + $0x10] sm:$0xff] }
  0xb3   : > { %v3260_v29 = vpop.trf.xlu1 }
  0xb4   : > { %v2773_v30 = vunpack.i.h.bf16 %v3260_v29  ;;  %v2770_v31 = vunpack.i.l.bf16 %v3260_v29  ;;  %v930_v32 = vpack.c.bf16 %v2698_v28, %v2693_v23  ;;  %v932_v33 = vpack.c.bf16 %v2701_v27, %v2696_v22  ;;  %v1717_v29 = vld [vmem:[%s3944_s7] sm:$0xff] }
  0xb5   : > { %v3272_v34 = vpop.trf.xlu0 }
  0xb6   : > { %v929_v35 = vpack.c.bf16 %v2770_v31, %v2765_v25  ;;  %v931_v36 = vpack.c.bf16 %v2773_v30, %v2768_v24  ;;  %1119 = vmatprep.subr.bf16.mxu0 %v930_v32  ;;  %1232 = vmatprep.subr.bf16.mxu1 %v932_v33  ;;  %v2706_v38 = vunpack.i.h.bf16 %v3272_v34  ;;  %v2703_v39 = vunpack.i.l.bf16 %v3272_v34  ;;  %v973_v32 = vld [vmem:[%s3940_s3] sm:$0xff] }
  0xb7   : > { %v3282_v37 = vpop.trf.xlu1  ;;  %v977_v33 = vld [vmem:[%s3940_s3 + $0x20] sm:$0xff] }
  0xb8   : > { %1120 = vmatpush1.bf16.msra.mxu0 %v929_v35  ;;  %1233 = vmatpush1.bf16.msra.mxu1 %v931_v36  ;;  %v2778_v40 = vunpack.i.h.bf16 %v3282_v37  ;;  %v2775_v41 = vunpack.i.l.bf16 %v3282_v37  ;;  %v978_v35 = vld [vmem:[%s3940_s3 + $0x28] sm:$0xff]  ;;  %v979_v36 = vld [vmem:[%s3940_s3 + $0x30] sm:$0xff] }
  0xb9   : > { %v3288_v42 = vpop.trf.xlu0 }
  0xba   : > { %v2711_v43 = vunpack.i.h.bf16 %v3288_v42  ;;  %v2708_v45 = vunpack.i.l.bf16 %v3288_v42  ;;  %v1719_v42 = vld [vmem:[%s3944_s7 + $0x10] sm:$0xff] }
  0xbb   : > { %v3292_v46 = vpop.trf.xlu1 }
  0xbc   : > { %v2783_v47 = vunpack.i.h.bf16 %v3292_v46  ;;  %v2780_v48 = vunpack.i.l.bf16 %v3292_v46  ;;  %v934_v49 = vpack.c.bf16 %v2708_v45, %v2703_v39  ;;  %v936_v50 = vpack.c.bf16 %v2711_v43, %v2706_v38  ;;  %v1992_v46 = vld [vmem:[%s3946_s9 + $0x20] sm:$0xff] }
  0xbd   : > { %v3304_v51 = vpop.trf.xlu0 }
  0xbe   : > { %v933_v52 = vpack.c.bf16 %v2780_v48, %v2775_v41  ;;  %v935_v53 = vpack.c.bf16 %v2783_v47, %v2778_v40  ;;  %1121 = vmatprep.subr.bf16.mxu0 %v934_v49  ;;  %1234 = vmatprep.subr.bf16.mxu1 %v936_v50  ;;  %v2716_v56 = vunpack.i.h.bf16 %v3304_v51  ;;  %v2713_v57 = vunpack.i.l.bf16 %v3304_v51  ;;  %v980_v49 = vld [vmem:[%s3940_s3 + $0x38] sm:$0xff]  ;;  %v981_v50 = vld [vmem:[%s3940_s3 + $0x40] sm:$0xff] }
  0xbf   : > { %v3317_v55 = vpop.trf.xlu1 }
  0xc0   : > { %1122 = vmatpush1.bf16.msra.mxu0 %v933_v52  ;;  %1235 = vmatpush1.bf16.msra.mxu1 %v935_v53  ;;  %v2788_v58 = vunpack.i.h.bf16 %v3317_v55  ;;  %v2785_v59 = vunpack.i.l.bf16 %v3317_v55  ;;  %v982_v52 = vld [vmem:[%s3940_s3 + $0x48] sm:$0xff]  ;;  %v983_v53 = vld [vmem:[%s3940_s3 + $0x50] sm:$0xff] }
  0xc1   : > { %2939 = vset.pattern.permute.xlu1 %v3949_v44  ;;  %v3324_v60 = vpop.trf.xlu0 }
  0xc2   : > { %996 = vperm.xlu1 %2939, %v974_v54   ;;  %v2721_v62 = vunpack.i.h.bf16 %v3324_v60  ;;  %v2718_v63 = vunpack.i.l.bf16 %v3324_v60  ;;  %v984_v54 = vld [vmem:[%s3940_s3 + $0x58] sm:$0xff]  ;;  %v1913_v60 = vld [vmem:[%s3945_s8 + $0x8] sm:$0xff] }
  0xc3   : > { %v3331_v0 = vpop.trf.xlu1 }
  0xc4   : > { %v3951_v1 = vunpack.i.h.bf16 %v3331_v0  ;;  %v2790_v2 = vunpack.i.l.bf16 %v3331_v0  ;;  %v938_v3 = vpack.c.bf16 %v2718_v63, %v2713_v57  ;;  %v940_v16 = vpack.c.bf16 %v2721_v62, %v2716_v56 }
  0xc6   : > { %1001 = vperm.xlu1 %2939, %v975_v61   ;;  %v937_v17 = vpack.c.bf16 %v2790_v2, %v2785_v59  ;;  %v939_v19 = vpack.c.bf16 %v3951_v1, %v2788_v58  ;;  %1123 = vmatprep.subr.bf16.mxu0 %v938_v3  ;;  %v985_v61 = vld [vmem:[%s3940_s3 + $0x60] sm:$0xff]  ;;  %v986_v3 = vld [vmem:[%s3940_s3 + $0x68] sm:$0xff] }
  0xc7   : > { %1236 = vmatprep.subr.bf16.mxu1 %v940_v16  ;;  %v987_v16 = vld [vmem:[%s3940_s3 + $0x70] sm:$0xff] }
  0xc8   : > { %1124 = vmatpush1.bf16.msra.mxu0 %v937_v17  ;;  %1237 = vmatpush1.bf16.msra.mxu1 %v939_v19  ;;  %v988_v17 = vld [vmem:[%s3940_s3 + $0x78] sm:$0xff]  ;;  %v1447_v19 = vld [vmem:[%s3942_s5] sm:$0xff] }
  0xca   : > { %1006 = vperm.xlu1 %2939, %v976_v20   ;;  %2938 = vset.pattern.permute.xlu0 %v3949_v44  ;;  %v1448_v20 = vld [vmem:[%s3942_s5 + $0x8] sm:$0xff] }
  0xcb   : > { %991 = vperm.xlu0 %2938, %v973_v32  }
  0xce   : > { %1011 = vperm.xlu1 %2939, %v977_v33  }
  0xcf   : > { %1016 = vperm.xlu0 %2938, %v978_v35  }
  0xd2   : > { %1021 = vperm.xlu1 %2939, %v979_v36  }
  0xd3   : > { %1026 = vperm.xlu0 %2938, %v980_v49   ;;  %v1449_v49 = vld [vmem:[%s3942_s5 + $0x10] sm:$0xff] }
  0xd6   : > { %1031 = vperm.xlu1 %2939, %v981_v50  }
  0xd7   : > { %1036 = vperm.xlu0 %2938, %v982_v52  }
  0xda   : > { %1041 = vperm.xlu1 %2939, %v983_v53   ;;  %v1450_v53 = vld [vmem:[%s3942_s5 + $0x18] sm:$0xff] }
  0xdb   : > { %1046 = vperm.xlu0 %2938, %v984_v54  }
  0xde   : > { %1051 = vperm.xlu1 %2939, %v985_v61  }
  0xdf   : > { %1056 = vperm.xlu0 %2938, %v986_v3  }
  0xe2   : > { %1061 = vperm.xlu1 %2939, %v987_v16  }
  0xe3   : > { %1066 = vperm.xlu0 %2938, %v988_v17  }
  0xe5   : > { %v2826_v32 = vpop.trf.xlu0 }
  0xe6   : > { %1457 = vperm.xlu1 %2939, %v1447_v19   ;;  %v2830_v33 = vunpack.i.h.bf16 %v2826_v32  ;;  %v2827_v35 = vunpack.i.l.bf16 %v2826_v32 }
  0xe7   : > { %v2898_v36 = vpop.trf.xlu1  ;;  %1462 = vperm.xlu0 %2938, %v1448_v20  }
  0xe8   : > { %v2902_v50 = vunpack.i.h.bf16 %v2898_v36  ;;  %v2899_v52 = vunpack.i.l.bf16 %v2898_v36  ;;  %v3408_v54 = vmul.f32 %v2827_v35, %v2683_v6  ;;  %v3412_v61 = vmul.f32 %v2830_v33, %v2686_v7  ;;  %v1451_v6 = vld [vmem:[%s3942_s5 + $0x20] sm:$0xff] }
  0xe9   : > { %v2831_v3 = vpop.trf.xlu0 }
  0xea   : > { %1467 = vperm.xlu1 %2939, %v1449_v49   ;;  %v3416_v16 = vmul.f32 %v2899_v52, %v2755_v9  ;;  %v3420_v17 = vmul.f32 %v2902_v50, %v2758_v10  ;;  %v2835_v19 = vunpack.i.h.bf16 %v2831_v3  ;;  %v2832_v20 = vunpack.i.l.bf16 %v2831_v3  ;;  %v1452_v9 = vld [vmem:[%s3942_s5 + $0x28] sm:$0xff] }
  0xeb   : > { %v2903_v32 = vpop.trf.xlu1  ;;  %1472 = vperm.xlu0 %2938, %v1450_v53  }
  0xec   : > { %v2907_v4 = vunpack.i.h.bf16 %v2903_v32  ;;  %v2904_v7 = vunpack.i.l.bf16 %v2903_v32  ;;  %v942_v36 = vpack.c.bf16 %v2832_v20, %v2827_v35  ;;  %v944_v49 = vpack.c.bf16 %v2835_v19, %v2830_v33 }
  0xed   : > { %v3430_v5 = vmul.f32 %v2832_v20, %v2688_v12  ;;  %v3434_v10 = vmul.f32 %v2835_v19, %v2691_v13  ;;  %v2836_v3 = vpop.trf.xlu0 }
  0xee   : > { %1477 = vperm.xlu1 %2939, %v1451_v6   ;;  %v941_v44 = vpack.c.bf16 %v2904_v7, %v2899_v52  ;;  %v943_v1 = vpack.c.bf16 %v2907_v4, %v2902_v50  ;;  %v3438_v35 = vmul.f32 %v2904_v7, %v2760_v14  ;;  %v3442_v33 = vmul.f32 %v2907_v4, %v2763_v15 }
  0xef   : > { %v2840_v53 = vunpack.i.h.bf16 %v2836_v3  ;;  %v2837_v32 = vunpack.i.l.bf16 %v2836_v3  ;;  %v2908_v12 = vpop.trf.xlu1  ;;  %1125 = vmatprep.subr.bf16.mxu0 %v942_v36  ;;  %1238 = vmatprep.subr.bf16.mxu1 %v944_v49 }
  0xf0   : > { %v2912_v13 = vunpack.i.h.bf16 %v2908_v12  ;;  %v2909_v52 = vunpack.i.l.bf16 %v2908_v12  ;;  %1482 = vperm.xlu0 %2938, %v1452_v9   ;;  %1126 = vmatpush1.bf16.msra.mxu0 %v941_v44 }
  0xf1   : > { %1239 = vmatpush1.bf16.msra.mxu1 %v943_v1  ;;  %v3452_v14 = vmul.f32 %v2837_v32, %v2693_v23  ;;  %v3456_v15 = vmul.f32 %v2840_v53, %v2696_v22  ;;  %v2841_v50 = vpop.trf.xlu0  ;;  %v1988_v23 = vld [vmem:[%s3946_s9] sm:$0xff] }
  0xf2   : > { %1487 = vperm.xlu1 %2939, %v1453_v8   ;;  %v3460_v19 = vmul.f32 %v2909_v52, %v2765_v25  ;;  %v3464_v44 = vmul.f32 %v2912_v13, %v2768_v24  ;;  %v2845_v1 = vunpack.i.h.bf16 %v2841_v50  ;;  %v2842_v20 = vunpack.i.l.bf16 %v2841_v50  ;;  %v1989_v25 = vld [vmem:[%s3946_s9 + $0x8] sm:$0xff] }
  0xf3   : > { %v2913_v6 = vpop.trf.xlu1 }
  0xf4   : > { %v2917_v18 = vunpack.i.h.bf16 %v2913_v6  ;;  %v2914_v22 = vunpack.i.l.bf16 %v2913_v6  ;;  %1492 = vperm.xlu0 %2938, %v1454_v11   ;;  %v946_v4 = vpack.c.bf16 %v2842_v20, %v2837_v32  ;;  %v948_v7 = vpack.c.bf16 %v2845_v1, %v2840_v53 }
  0xf5   : > { %v3474_v21 = vmul.f32 %v2842_v20, %v2698_v28  ;;  %v3478_v24 = vmul.f32 %v2845_v1, %v2701_v27  ;;  %v2846_v36 = vpop.trf.xlu0 }
  0xf6   : > { %1998 = vperm.xlu1 %2939, %v1988_v23   ;;  %v945_v49 = vpack.c.bf16 %v2914_v22, %v2909_v52  ;;  %v947_v9 = vpack.c.bf16 %v2917_v18, %v2912_v13  ;;  %v3482_v3 = vmul.f32 %v2914_v22, %v2770_v31  ;;  %v3486_v53 = vmul.f32 %v2917_v18, %v2773_v30 }
  0xf7   : > { %v2850_v32 = vunpack.i.h.bf16 %v2846_v36  ;;  %v2847_v12 = vunpack.i.l.bf16 %v2846_v36  ;;  %v2918_v28 = vpop.trf.xlu1  ;;  %1127 = vmatprep.subr.bf16.mxu0 %v946_v4  ;;  %1240 = vmatprep.subr.bf16.mxu1 %v948_v7 }
  0xf8   : > { %v2922_v27 = vunpack.i.h.bf16 %v2918_v28  ;;  %v2919_v8 = vunpack.i.l.bf16 %v2918_v28  ;;  %2003 = vperm.xlu0 %2938, %v1989_v25   ;;  %1128 = vmatpush1.bf16.msra.mxu0 %v945_v49 }
  0xf9   : > { %1241 = vmatpush1.bf16.msra.mxu1 %v947_v9  ;;  %v3496_v30 = vmul.f32 %v2847_v12, %v2703_v39  ;;  %v3500_v31 = vmul.f32 %v2850_v32, %v2706_v38  ;;  %v2851_v13 = vpop.trf.xlu0  ;;  %v1718_v39 = vld [vmem:[%s3944_s7 + $0x8] sm:$0xff] }
  0xfa   : > { %2008 = vperm.xlu1 %2939, %v1990_v26   ;;  %v3504_v52 = vmul.f32 %v2919_v8, %v2775_v41  ;;  %v3508_v11 = vmul.f32 %v2922_v27, %v2778_v40  ;;  %v2855_v50 = vunpack.i.h.bf16 %v2851_v13  ;;  %v2852_v1 = vunpack.i.l.bf16 %v2851_v13  ;;  %v1991_v41 = vld [vmem:[%s3946_s9 + $0x18] sm:$0xff] }
  0xfb   : > { %v2923_v20 = vpop.trf.xlu1 }
  0xfc   : > { %v2927_v34 = vunpack.i.h.bf16 %v2923_v20  ;;  %v2924_v38 = vunpack.i.l.bf16 %v2923_v20  ;;  %1723 = vperm.xlu0 %2938, %v1717_v29   ;;  %v950_v6 = vpack.c.bf16 %v2852_v1, %v2847_v12  ;;  %v952_v23 = vpack.c.bf16 %v2855_v50, %v2850_v32 }
  0xfd   : > { %v3518_v37 = vmul.f32 %v2852_v1, %v2708_v45  ;;  %v3522_v40 = vmul.f32 %v2855_v50, %v2711_v43  ;;  %v2856_v18 = vpop.trf.xlu0 }
  0xfe   : > { %v949_v22 = vpack.c.bf16 %v2924_v38, %v2919_v8  ;;  %v951_v4 = vpack.c.bf16 %v2927_v34, %v2922_v27  ;;  %1728 = vperm.xlu1 %2939, %v1718_v39   ;;  %v3526_v7 = vmul.f32 %v2924_v38, %v2780_v48  ;;  %v3530_v25 = vmul.f32 %v2927_v34, %v2783_v47 }
  0xff   : > { %v2860_v36 = vunpack.i.h.bf16 %v2856_v18  ;;  %v2857_v49 = vunpack.i.l.bf16 %v2856_v18  ;;  %v2928_v45 = vpop.trf.xlu1  ;;  %1129 = vmatprep.subr.bf16.mxu0 %v950_v6  ;;  %1242 = vmatprep.subr.bf16.mxu1 %v952_v23  ;;  %v3963_v39 = vunpack.i.h.bf16 %v3331_v0  ;;  %v1914_v0 = vld [vmem:[%s3945_s8 + $0x10] sm:$0xff]  ;;  %v3964_v38 = vmov 0   ;;  %v2941_v6 = vld [vmem:[%s3939_s2 + $0x8] sm:$0xff]   ;;  %v1915_v23 = vld [vmem:[%s3945_s8 + $0x18] sm:$0xff] }
 0x100   : > { %v2932_v43 = vunpack.i.h.bf16 %v2928_v45  ;;  %v2929_v9 = vunpack.i.l.bf16 %v2928_v45  ;;  %2013 = vperm.xlu0 %2938, %v1991_v41   ;;  %1130 = vmatpush1.bf16.msra.mxu0 %v949_v22  ;;  %v1995_v41 = vld [vmem:[%s3946_s9 + $0x38] sm:$0xff]  ;;  %v2124_v18 = vld [vmem:[#allocation2] sm:$0x1]  ;;  %v2942_v22 = vld [vmem:[%s3939_s2 + $0x10] sm:$0xff]  }
 0x101   : > { %1243 = vmatpush1.bf16.msra.mxu1 %v951_v4  ;;  %v3540_v47 = vmul.f32 %v2857_v49, %v2713_v57  ;;  %v3544_v48 = vmul.f32 %v2860_v36, %v2716_v56  ;;  %v2861_v32 = vpop.trf.xlu0  ;;  %v1720_v57 = vld [vmem:[%s3944_s7 + $0x18] sm:$0xff]  ;;  %v2946_v45 = vld [vmem:[%s3939_s2 + $0x30] sm:$0xff]  }
 0x102   : > { %1733 = vperm.xlu1 %2939, %v1719_v42   ;;  %v3548_v12 = vmul.f32 %v2929_v9, %v2785_v59  ;;  %v3552_v28 = vmul.f32 %v2932_v43, %v2788_v58  ;;  %v2865_v26 = vunpack.i.h.bf16 %v2861_v32  ;;  %v2862_v27 = vunpack.i.l.bf16 %v2861_v32  ;;  %v1912_v59 = vld [vmem:[%s3945_s8] sm:$0xff]  ;;  %v2943_v4 = vld [vmem:[%s3939_s2 + $0x18] sm:$0xff]  }
 0x103   : > { %v2933_v8 = vpop.trf.xlu1  ;;  %v2947_v42 = vld [vmem:[%s3939_s2 + $0x38] sm:$0xff]  }
 0x104   : > { %v2937_v51 = vunpack.i.h.bf16 %v2933_v8  ;;  %v2934_v56 = vunpack.i.l.bf16 %v2933_v8  ;;  %2018 = vperm.xlu0 %2938, %v1992_v46   ;;  %v954_v29 = vpack.c.bf16 %v2862_v27, %v2857_v49  ;;  %v956_v13 = vpack.c.bf16 %v2865_v26, %v2860_v36  ;;  %v2944_v36 = vld [vmem:[%s3939_s2 + $0x20] sm:$0xff]   ;;  %v2945_v49 = vld [vmem:[%s3939_s2 + $0x28] sm:$0xff]  }
 0x105   : > { %v3562_v55 = vmul.f32 %v2862_v27, %v2718_v63  ;;  %v3566_v58 = vmul.f32 %v2865_v26, %v2721_v62  ;;  %v2940_v63 = vld [vmem:[%s3939_s2] sm:$0xff]   ;;  %v1993_v62 = vld [vmem:[%s3946_s9 + $0x28] sm:$0xff] }
 0x106   : > { %v953_v50 = vpack.c.bf16 %v2934_v56, %v2929_v9  ;;  %v955_v1 = vpack.c.bf16 %v2937_v51, %v2932_v43  ;;  %1738 = vperm.xlu1 %2939, %v1720_v57   ;;  %v3570_v20 = vmul.f32 %v2934_v56, %v2790_v2  ;;  %v3574_v34 = vmul.f32 %v2937_v51, %v3963_v39  ;;  %v1994_v2 = vld [vmem:[%s3946_s9 + $0x30] sm:$0xff] }
 0x107   : > { %1131 = vmatprep.subr.bf16.mxu0 %v954_v29  ;;  %1244 = vmatprep.subr.bf16.mxu1 %v956_v13 }
 0x108   : > { %1918 = vperm.xlu0 %2938, %v1912_v59   ;;  %1132 = vmatpush1.bf16.msra.mxu0 %v953_v50 }
 0x109   : > { %1245 = vmatpush1.bf16.msra.mxu1 %v955_v1 }
 0x10a   : > { %1923 = vperm.xlu1 %2939, %v1913_v60  }
 0x10b   : > { %1150 = vmatmul.mubr.bf16.vlgmr.msra.gmra.mrb[0].mxu0 %v2940_v63 }
 0x10c   : > { %1263 = vmatmul.mubr.bf16.vlgmr.msra.gmra.mrb[0].mxu1 %v2940_v63  ;;  %2023 = vperm.xlu0 %2938, %v1993_v62  }
 0x10d   : > { %1159 = vmatprep.mubr.bf16.mxu0 %v3964_v38  ;;  %1272 = vmatprep.mubr.bf16.mxu1 %v3964_v38 }
 0x10e   : > { %1928 = vperm.xlu1 %2939, %v1914_v0  }
 0x110   : > { %2028 = vperm.xlu0 %2938, %v1994_v2  }
 0x112   : > { %1933 = vperm.xlu1 %2939, %v1915_v23  }
 0x113   : > { %1160 = vmatmul.mubr.bf16.gmra.mrb[4].mxu0 %v2941_v6 }
 0x114   : > { %1273 = vmatmul.mubr.bf16.gmra.mrb[4].mxu1 %v2941_v6  ;;  %2033 = vperm.xlu0 %2938, %v1995_v41  }
 0x115   : > { %1169 = vmatprep.mubr.bf16.mxu0 %v3964_v38  ;;  %1282 = vmatprep.mubr.bf16.mxu1 %v3964_v38 }
 0x116   : > { %2127 = vperm.xlu1 %2939, %v2124_v18  }
 0x11b   : > { %1170 = vmatmul.mubr.bf16.gmra.mrb[8].mxu0 %v2942_v22 }
 0x11c   : > { %1283 = vmatmul.mubr.bf16.gmra.mrb[8].mxu1 %v2942_v22  ;;  %1179 = vmatprep.mubr.bf16.mxu0 %v3964_v38 }
 0x11d   : > { %1292 = vmatprep.mubr.bf16.mxu1 %v3964_v38 }
 0x123   : > { %1180 = vmatmul.mubr.bf16.gmra.mrb[12].mxu0 %v2943_v4 }
 0x124   : > { %1293 = vmatmul.mubr.bf16.gmra.mrb[12].mxu1 %v2943_v4  ;;  %1189 = vmatprep.mubr.bf16.mxu0 %v3964_v38 }
 0x125   : > { %1302 = vmatprep.mubr.bf16.mxu1 %v3964_v38 }
 0x12b   : > { %1190 = vmatmul.mubr.bf16.gmra.mrb[16].mxu0 %v2944_v36 }
 0x12c   : > { %1303 = vmatmul.mubr.bf16.gmra.mrb[16].mxu1 %v2944_v36  ;;  %1199 = vmatprep.mubr.bf16.mxu0 %v3964_v38 }
 0x12d   : > { %1312 = vmatprep.mubr.bf16.mxu1 %v3964_v38 }
 0x133   : > { %1200 = vmatmul.mubr.bf16.gmra.mrb[20].mxu0 %v2945_v49 }
 0x134   : > { %1313 = vmatmul.mubr.bf16.gmra.mrb[20].mxu1 %v2945_v49  ;;  %1209 = vmatprep.mubr.bf16.mxu0 %v3964_v38 }
 0x135   : > { %1322 = vmatprep.mubr.bf16.mxu1 %v3964_v38 }
 0x13b   : > { %1210 = vmatmul.mubr.bf16.gmra.mrb[24].mxu0 %v2946_v45 }
 0x13c   : > { %1323 = vmatmul.mubr.bf16.gmra.mrb[24].mxu1 %v2946_v45  ;;  %1219 = vmatprep.mubr.bf16.mxu0 %v3964_v38 }
 0x13d   : > { %1332 = vmatprep.mubr.bf16.mxu1 %v3964_v38 }
 0x141   : > { %v3632_v43 = vpop.permute.xlu1 %996 }
 0x143   : > { %1220 = vmatmul.mubr.bf16.gmra.mrb[28].mxu0 %v2947_v42 }
 0x144   : > { %1333 = vmatmul.mubr.bf16.gmra.mrb[28].mxu1 %v2947_v42  ;;  %1551 = vmatprep.mubr.bf16.mxu0 %v3964_v38 }
 0x145   : > { %v3635_v9 = vpop.permute.xlu1 %1001  ;;  %1624 = vmatprep.mubr.bf16.mxu1 %v3964_v38 }
 0x149   : > { %v3638_v46 = vpop.permute.xlu1 %1006 }
 0x14a   : > { %v3640_v32 = vpop.permute.xlu0 %991 }
 0x14d   : > { %v3642_v26 = vpop.permute.xlu1 %1011 }
 0x14e   : > { %v3644_v27 = vpop.permute.xlu0 %1016 }
 0x151   : > { %v3646_v8 = vpop.permute.xlu1 %1021 }
 0x152   : > { %v3648_v57 = vpop.permute.xlu0 %1026 }
 0x155   : > { %v3650_v51 = vpop.permute.xlu1 %1031 }
 0x156   : > { %v3652_v56 = vpop.permute.xlu0 %1036 }
 0x159   : > { %v3654_v29 = vpop.permute.xlu1 %1041 }
 0x15a   : > { %v3656_v13 = vpop.permute.xlu0 %1046 }
 0x15d   : > { %v3658_v59 = vpop.permute.xlu1 %1051 }
 0x15e   : > { %v3660_v50 = vpop.permute.xlu0 %1056 }
 0x161   : > { %v3662_v1 = vpop.permute.xlu1 %1061 }
 0x162   : > { %v3664_v39 = vpop.permute.xlu0 %1066 }
 0x165   : > { %v3666_v63 = vpop.permute.xlu1 %1457 }
 0x166   : > { %3965 = vst [vmem:[#allocation6_spill] sm:$0xff] %v3666_v63  ;;  %v3668_v60 = vpop.permute.xlu0 %1462 }
 0x167   : > { %3966 = vst [vmem:[#allocation7_spill] sm:$0xff] %v3668_v60 }
 0x169   : > { %v3670_v62 = vpop.permute.xlu1 %1467 }
 0x16a   : > { %3967 = vst [vmem:[#allocation8_spill] sm:$0xff] %v3670_v62  ;;  %v3672_v0 = vpop.permute.xlu0 %1472 }
 0x16b   : > { %3968 = vst [vmem:[#allocation9_spill] sm:$0xff] %v3672_v0 }
 0x16d   : > { %v3674_v2 = vpop.permute.xlu1 %1477 }
 0x16e   : > { %3969 = vst [vmem:[#allocation10_spill] sm:$0xff] %v3674_v2 }
 0x16f   : > { %v3676_v6 = vpop.permute.xlu0 %1482 }
 0x170   : > { %3970 = vst [vmem:[#allocation11_spill] sm:$0xff] %v3676_v6 }
 0x171   : > { %v3678_v23 = vpop.permute.xlu1 %1487 }
 0x172   : > { %3971 = vst [vmem:[#allocation12_spill] sm:$0xff] %v3678_v23 }
 0x173   : > { %v3680_v41 = vpop.permute.xlu0 %1492 }
 0x174   : > { %3972 = vst [vmem:[#allocation13_spill] sm:$0xff] %v3680_v41 }
 0x175   : > { %v1999_v18 = vpop.permute.xlu1 %1998 }
 0x176   : > { %v2036_v22 = vmul.f32 %v1999_v18, %v3416_v16  ;;  %v2037_v4 = vmul.f32 %v1999_v18, %v3408_v54  ;;  %v2038_v36 = vmul.f32 %v1999_v18, %v3420_v17  ;;  %v2039_v49 = vmul.f32 %v1999_v18, %v3412_v61 }
 0x177   : > { %v2004_v45 = vpop.permute.xlu0 %2003 }
 0x178   : > { %v2040_v42 = vmul.f32 %v2004_v45, %v3438_v35  ;;  %v2041_v2 = vmul.f32 %v2004_v45, %v3430_v5  ;;  %v2042_v6 = vmul.f32 %v2004_v45, %v3442_v33  ;;  %v2043_v23 = vmul.f32 %v2004_v45, %v3434_v10 }
 0x179   : > { %v2009_v0 = vpop.permute.xlu1 %2008 }
 0x17a   : > { %v2068_v41 = vadd.f32 %v2040_v42, %v2036_v22  ;;  %v2081_v62 = vadd.f32 %v2041_v2, %v2037_v4  ;;  %v2094_v60 = vadd.f32 %v2042_v6, %v2038_v36  ;;  %v2107_v16 = vadd.f32 %v2043_v23, %v2039_v49 }
 0x17b   : > { %v2044_v54 = vmul.f32 %v2009_v0, %v3460_v19  ;;  %v2045_v17 = vmul.f32 %v2009_v0, %v3452_v14  ;;  %v2046_v61 = vmul.f32 %v2009_v0, %v3464_v44  ;;  %v2047_v18 = vmul.f32 %v2009_v0, %v3456_v15  ;;  %v3694_v35 = vpop.permute.xlu0 %1723 }
 0x17d   : > { %v2069_v5 = vadd.f32 %v2068_v41, %v2044_v54  ;;  %v2082_v63 = vadd.f32 %v2081_v62, %v2045_v17  ;;  %v2095_v33 = vadd.f32 %v2094_v60, %v2046_v61  ;;  %v2108_v38 = vadd.f32 %v2107_v16, %v2047_v18 }
 0x17f   : > { %v2014_v10 = vpop.permute.xlu0 %2013 }
 0x180   : > { %v2048_v22 = vmul.f32 %v2014_v10, %v3482_v3  ;;  %v2049_v2 = vmul.f32 %v2014_v10, %v3474_v21  ;;  %v2050_v6 = vmul.f32 %v2014_v10, %v3486_v53  ;;  %v2051_v19 = vmul.f32 %v2014_v10, %v3478_v24 }
 0x182   : > { %v2070_v14 = vadd.f32 %v2069_v5, %v2048_v22  ;;  %v2083_v23 = vadd.f32 %v2082_v63, %v2049_v2  ;;  %v2096_v44 = vadd.f32 %v2095_v33, %v2050_v6  ;;  %v2109_v4 = vadd.f32 %v2108_v38, %v2051_v19 }
 0x183   : > { %v2019_v15 = vpop.permute.xlu0 %2018 }
 0x184   : > { %v2052_v0 = vmul.f32 %v2019_v15, %v3504_v52  ;;  %v2053_v62 = vmul.f32 %v2019_v15, %v3496_v30  ;;  %v2054_v60 = vmul.f32 %v2019_v15, %v3508_v11  ;;  %v2055_v41 = vmul.f32 %v2019_v15, %v3500_v31 }
 0x186   : > { %v2071_v3 = vadd.f32 %v2070_v14, %v2052_v0  ;;  %v2084_v36 = vadd.f32 %v2083_v23, %v2053_v62  ;;  %v2097_v21 = vadd.f32 %v2096_v44, %v2054_v60  ;;  %v2110_v49 = vadd.f32 %v2109_v4, %v2055_v41 }
 0x187   : > { %v3704_v53 = vpop.permute.xlu0 %1918 }
 0x18b   : > { %v2024_v24 = vpop.permute.xlu0 %2023 }
 0x18c   : > { %v2056_v63 = vmul.f32 %v2024_v24, %v3526_v7  ;;  %v2057_v38 = vmul.f32 %v2024_v24, %v3518_v37  ;;  %v2058_v45 = vmul.f32 %v2024_v24, %v3530_v25  ;;  %v2059_v52 = vmul.f32 %v2024_v24, %v3522_v40 }
 0x18e   : > { %v2072_v30 = vadd.f32 %v2071_v3, %v2056_v63  ;;  %v2085_v42 = vadd.f32 %v2084_v36, %v2057_v38  ;;  %v2098_v11 = vadd.f32 %v2097_v21, %v2058_v45  ;;  %v2111_v16 = vadd.f32 %v2110_v49, %v2059_v52 }
 0x18f   : > { %v2029_v31 = vpop.permute.xlu0 %2028 }
 0x190   : > { %v2060_v54 = vmul.f32 %v2029_v31, %v3548_v12  ;;  %v2061_v17 = vmul.f32 %v2029_v31, %v3540_v47  ;;  %v2062_v61 = vmul.f32 %v2029_v31, %v3552_v28  ;;  %v2063_v18 = vmul.f32 %v2029_v31, %v3544_v48 }
 0x192   : > { %v2073_v7 = vadd.f32 %v2072_v30, %v2060_v54  ;;  %v2086_v5 = vadd.f32 %v2085_v42, %v2061_v17  ;;  %v2099_v37 = vadd.f32 %v2098_v11, %v2062_v61  ;;  %v2112_v33 = vadd.f32 %v2111_v16, %v2063_v18 }
 0x193   : > { %v2034_v25 = vpop.permute.xlu0 %2033 }
 0x194   : > { %v2064_v40 = vmul.f32 %v2034_v25, %v3570_v20  ;;  %v2065_v10 = vmul.f32 %v2034_v25, %v3562_v55  ;;  %v2066_v22 = vmul.f32 %v2034_v25, %v3574_v34  ;;  %v2067_v2 = vmul.f32 %v2034_v25, %v3566_v58 }
 0x196   : > { %v3718_v12 = vadd.f32 %v2073_v7, %v2064_v40  ;;  %v3720_v47 = vadd.f32 %v2086_v5, %v2065_v10  ;;  %v3722_v28 = vadd.f32 %v2099_v37, %v2066_v22  ;;  %v3724_v48 = vadd.f32 %v2112_v33, %v2067_v2 }
 0x1de   : > { %v1151_v6 = vpop.f32.mrb[0].mxu0 }
 0x1df   : > { %v1152_v19 = vadd.f32 %v1151_v6, %v3640_v32  ;;  %v1264_v14 = vpop.f32.mrb[0].mxu1  ;;  %v1153_v23 = vpop.f32.mrb[1].mxu0 }
 0x1e0   : > { %v1265_v20 = vadd.f32 %v1264_v14, %v3640_v32  ;;  %v1154_v55 = vadd.f32 %v1153_v23, %v3640_v32  ;;  %v1266_v34 = vpop.f32.mrb[1].mxu1  ;;  %v1155_v44 = vpop.f32.mrb[2].mxu0 }
 0x1e1   : > { %v1267_v58 = vadd.f32 %v1266_v34, %v3640_v32  ;;  %v1156_v4 = vadd.f32 %v1155_v44, %v3632_v43  ;;  %v1268_v15 = vpop.f32.mrb[2].mxu1  ;;  %v1157_v0 = vpop.f32.mrb[3].mxu0  ;;  %v1343_v3 = vmax.f32 %v1152_v19, 0.0 }
 0x1e2   : > { %v1269_v62 = vadd.f32 %v1268_v15, %v3632_v43  ;;  %v1158_v60 = vadd.f32 %v1157_v0, %v3632_v43  ;;  %v1270_v41 = vpop.f32.mrb[3].mxu1  ;;  %v1345_v49 = vmax.f32 %v1265_v20, 0.0  ;;  %v1344_v24 = vmax.f32 %v1154_v55, 0.0 }
 0x1e3   : > { %v1347_v36 = vmax.f32 %v1156_v4, 0.0  ;;  %v1271_v21 = vadd.f32 %v1270_v41, %v3632_v43  ;;  %v1346_v45 = vmax.f32 %v1267_v58, 0.0 }
 0x1e4   : > { %v1349_v63 = vmax.f32 %v1269_v62, 0.0  ;;  %v1348_v38 = vmax.f32 %v1158_v60, 0.0 }
 0x1e5   : > { %v1415_v52 = vpack.c.bf16 %v1347_v36, %v1343_v3  ;;  %v1350_v32 = vmax.f32 %v1271_v21, 0.0 }
 0x1e6   : > { %v1417_v30 = vpack.c.bf16 %v1349_v63, %v1345_v49  ;;  %v1416_v42 = vpack.c.bf16 %v1348_v38, %v1344_v24  ;;  %v1161_v11 = vpop.f32.mrb[4].mxu0 }
 0x1e7   : > { %v1418_v16 = vpack.c.bf16 %v1350_v32, %v1346_v45  ;;  %v1162_v31 = vadd.f32 %v1161_v11, %v3635_v9  ;;  %v1274_v54 = vpop.f32.mrb[4].mxu1  ;;  %v1163_v17 = vpop.f32.mrb[5].mxu0 }
 0x1e8   : > { %v1275_v61 = vadd.f32 %v1274_v54, %v3635_v9  ;;  %v1164_v18 = vadd.f32 %v1163_v17, %v3635_v9  ;;  %v1276_v43 = vpop.f32.mrb[5].mxu1  ;;  %v1165_v7 = vpop.f32.mrb[6].mxu0  ;;  %1519 = vmatprep.subr.bf16.mxu0 %v1416_v42 }
 0x1e9   : > { %v1277_v5 = vadd.f32 %v1276_v43, %v3635_v9  ;;  %v1166_v37 = vadd.f32 %v1165_v7, %v3638_v46  ;;  %v1278_v33 = vpop.f32.mrb[6].mxu1  ;;  %1592 = vmatprep.subr.bf16.mxu1 %v1418_v16  ;;  %v1167_v25 = vpop.f32.mrb[7].mxu0  ;;  %1520 = vmatpush1.bf16.msra.mxu0 %v1415_v52  ;;  %v1351_v2 = vmax.f32 %v1162_v31, 0.0 }
 0x1ea   : > { %v1279_v40 = vadd.f32 %v1278_v33, %v3638_v46  ;;  %v1168_v10 = vadd.f32 %v1167_v25, %v3638_v46  ;;  %v1280_v22 = vpop.f32.mrb[7].mxu1  ;;  %1593 = vmatpush1.bf16.msra.mxu1 %v1417_v30  ;;  %v1353_v14 = vmax.f32 %v1275_v61, 0.0  ;;  %v1352_v23 = vmax.f32 %v1164_v18, 0.0 }
 0x1eb   : > { %v1355_v6 = vmax.f32 %v1166_v37, 0.0  ;;  %v1281_v19 = vadd.f32 %v1280_v22, %v3638_v46  ;;  %v1354_v55 = vmax.f32 %v1277_v5, 0.0 }
 0x1ec   : > { %v1357_v20 = vmax.f32 %v1279_v40, 0.0  ;;  %v1356_v9 = vmax.f32 %v1168_v10, 0.0 }
 0x1ed   : > { %v1419_v34 = vpack.c.bf16 %v1355_v6, %v1351_v2  ;;  %v1358_v44 = vmax.f32 %v1281_v19, 0.0 }
 0x1ee   : > { %v1421_v58 = vpack.c.bf16 %v1357_v20, %v1353_v14  ;;  %v1420_v4 = vpack.c.bf16 %v1356_v9, %v1352_v23  ;;  %v1171_v15 = vpop.f32.mrb[8].mxu0 }
 0x1ef   : > { %v1422_v0 = vpack.c.bf16 %v1358_v44, %v1354_v55  ;;  %v1172_v62 = vadd.f32 %v1171_v15, %v3642_v26  ;;  %v1284_v60 = vpop.f32.mrb[8].mxu1  ;;  %v1173_v41 = vpop.f32.mrb[9].mxu0 }
 0x1f0   : > { %v1285_v3 = vadd.f32 %v1284_v60, %v3642_v26  ;;  %v1174_v36 = vadd.f32 %v1173_v41, %v3642_v26  ;;  %v1286_v46 = vpop.f32.mrb[9].mxu1  ;;  %v1175_v21 = vpop.f32.mrb[10].mxu0  ;;  %1521 = vmatprep.subr.bf16.mxu0 %v1420_v4 }
 0x1f1   : > { %v1287_v49 = vadd.f32 %v1286_v46, %v3642_v26  ;;  %v1176_v24 = vadd.f32 %v1175_v21, %v3644_v27  ;;  %v1288_v63 = vpop.f32.mrb[10].mxu1  ;;  %1594 = vmatprep.subr.bf16.mxu1 %v1422_v0  ;;  %v1177_v38 = vpop.f32.mrb[11].mxu0  ;;  %1522 = vmatpush1.bf16.msra.mxu0 %v1419_v34  ;;  %v1359_v30 = vmax.f32 %v1172_v62, 0.0 }
 0x1f2   : > { %v1289_v45 = vadd.f32 %v1288_v63, %v3644_v27  ;;  %v1178_v52 = vadd.f32 %v1177_v38, %v3644_v27  ;;  %v1290_v32 = vpop.f32.mrb[11].mxu1  ;;  %1595 = vmatpush1.bf16.msra.mxu1 %v1421_v58  ;;  %v1361_v16 = vmax.f32 %v1285_v3, 0.0  ;;  %v1360_v31 = vmax.f32 %v1174_v36, 0.0 }
 0x1f3   : > { %v1363_v42 = vmax.f32 %v1176_v24, 0.0  ;;  %v1291_v11 = vadd.f32 %v1290_v32, %v3644_v27  ;;  %v1362_v17 = vmax.f32 %v1287_v49, 0.0 }
 0x1f4   : > { %v1365_v54 = vmax.f32 %v1289_v45, 0.0  ;;  %v1364_v26 = vmax.f32 %v1178_v52, 0.0 }
 0x1f5   : > { %v1423_v61 = vpack.c.bf16 %v1363_v42, %v1359_v30  ;;  %v1366_v18 = vmax.f32 %v1291_v11, 0.0 }
 0x1f6   : > { %v1425_v43 = vpack.c.bf16 %v1365_v54, %v1361_v16  ;;  %v1424_v7 = vpack.c.bf16 %v1364_v26, %v1360_v31  ;;  %v1181_v5 = vpop.f32.mrb[12].mxu0 }
 0x1f7   : > { %v1426_v37 = vpack.c.bf16 %v1366_v18, %v1362_v17  ;;  %v1182_v33 = vadd.f32 %v1181_v5, %v3646_v8  ;;  %v1294_v25 = vpop.f32.mrb[12].mxu1  ;;  %v1183_v40 = vpop.f32.mrb[13].mxu0 }
 0x1f8   : > { %v1295_v10 = vadd.f32 %v1294_v25, %v3646_v8  ;;  %v1184_v22 = vadd.f32 %v1183_v40, %v3646_v8  ;;  %v1296_v27 = vpop.f32.mrb[13].mxu1  ;;  %v1185_v2 = vpop.f32.mrb[14].mxu0  ;;  %1523 = vmatprep.subr.bf16.mxu0 %v1424_v7 }
 0x1f9   : > { %v1297_v6 = vadd.f32 %v1296_v27, %v3646_v8  ;;  %v1186_v19 = vadd.f32 %v1185_v2, %v3648_v57  ;;  %v1298_v14 = vpop.f32.mrb[14].mxu1  ;;  %1596 = vmatprep.subr.bf16.mxu1 %v1426_v37  ;;  %v1187_v23 = vpop.f32.mrb[15].mxu0  ;;  %1524 = vmatpush1.bf16.msra.mxu0 %v1423_v61  ;;  %v1367_v34 = vmax.f32 %v1182_v33, 0.0 }
 0x1fa   : > { %v1299_v20 = vadd.f32 %v1298_v14, %v3648_v57  ;;  %v1188_v9 = vadd.f32 %v1187_v23, %v3648_v57  ;;  %v1300_v55 = vpop.f32.mrb[15].mxu1  ;;  %1597 = vmatpush1.bf16.msra.mxu1 %v1425_v43  ;;  %v1369_v4 = vmax.f32 %v1295_v10, 0.0  ;;  %v1368_v15 = vmax.f32 %v1184_v22, 0.0 }
 0x1fb   : > { %v1371_v44 = vmax.f32 %v1186_v19, 0.0  ;;  %v1301_v58 = vadd.f32 %v1300_v55, %v3648_v57  ;;  %v1370_v62 = vmax.f32 %v1297_v6, 0.0 }
 0x1fc   : > { %v1373_v0 = vmax.f32 %v1299_v20, 0.0  ;;  %v1372_v8 = vmax.f32 %v1188_v9, 0.0 }
 0x1fd   : > { %v1427_v60 = vpack.c.bf16 %v1371_v44, %v1367_v34  ;;  %v1374_v41 = vmax.f32 %v1301_v58, 0.0 }
 0x1fe   : > { %v1429_v3 = vpack.c.bf16 %v1373_v0, %v1369_v4  ;;  %v1428_v36 = vpack.c.bf16 %v1372_v8, %v1368_v15  ;;  %v1191_v46 = vpop.f32.mrb[16].mxu0 }
 0x1ff   : > { %v1430_v21 = vpack.c.bf16 %v1374_v41, %v1370_v62  ;;  %v1192_v49 = vadd.f32 %v1191_v46, %v3650_v51  ;;  %v1304_v24 = vpop.f32.mrb[16].mxu1  ;;  %v1193_v63 = vpop.f32.mrb[17].mxu0 }
 0x200   : > { %v1305_v38 = vadd.f32 %v1304_v24, %v3650_v51  ;;  %v1194_v45 = vadd.f32 %v1193_v63, %v3650_v51  ;;  %v1306_v57 = vpop.f32.mrb[17].mxu1  ;;  %v1195_v52 = vpop.f32.mrb[18].mxu0  ;;  %1525 = vmatprep.subr.bf16.mxu0 %v1428_v36 }
 0x201   : > { %v1307_v32 = vadd.f32 %v1306_v57, %v3650_v51  ;;  %v1196_v30 = vadd.f32 %v1195_v52, %v3652_v56  ;;  %v1308_v42 = vpop.f32.mrb[18].mxu1  ;;  %1598 = vmatprep.subr.bf16.mxu1 %v1430_v21  ;;  %v1197_v11 = vpop.f32.mrb[19].mxu0  ;;  %1526 = vmatpush1.bf16.msra.mxu0 %v1427_v60  ;;  %v1375_v26 = vmax.f32 %v1192_v49, 0.0 }
 0x202   : > { %v1309_v16 = vadd.f32 %v1308_v42, %v3652_v56  ;;  %v1198_v31 = vadd.f32 %v1197_v11, %v3652_v56  ;;  %v1310_v54 = vpop.f32.mrb[19].mxu1  ;;  %1599 = vmatpush1.bf16.msra.mxu1 %v1429_v3  ;;  %v1377_v18 = vmax.f32 %v1305_v38, 0.0  ;;  %v1376_v43 = vmax.f32 %v1194_v45, 0.0 }
 0x203   : > { %v1379_v17 = vmax.f32 %v1196_v30, 0.0  ;;  %v1311_v61 = vadd.f32 %v1310_v54, %v3652_v56  ;;  %v1378_v5 = vmax.f32 %v1307_v32, 0.0 }
 0x204   : > { %v1381_v7 = vmax.f32 %v1309_v16, 0.0  ;;  %v1380_v51 = vmax.f32 %v1198_v31, 0.0 }
 0x205   : > { %v1431_v37 = vpack.c.bf16 %v1379_v17, %v1375_v26  ;;  %v1382_v33 = vmax.f32 %v1311_v61, 0.0 }
 0x206   : > { %v1433_v25 = vpack.c.bf16 %v1381_v7, %v1377_v18  ;;  %v1432_v40 = vpack.c.bf16 %v1380_v51, %v1376_v43  ;;  %v1201_v10 = vpop.f32.mrb[20].mxu0 }
 0x207   : > { %v1434_v22 = vpack.c.bf16 %v1382_v33, %v1378_v5  ;;  %v1202_v27 = vadd.f32 %v1201_v10, %v3654_v29  ;;  %v1314_v2 = vpop.f32.mrb[20].mxu1  ;;  %v1203_v6 = vpop.f32.mrb[21].mxu0 }
 0x208   : > { %v1315_v19 = vadd.f32 %v1314_v2, %v3654_v29  ;;  %v1204_v14 = vadd.f32 %v1203_v6, %v3654_v29  ;;  %v1316_v56 = vpop.f32.mrb[21].mxu1  ;;  %v1205_v23 = vpop.f32.mrb[22].mxu0  ;;  %1527 = vmatprep.subr.bf16.mxu0 %v1432_v40 }
 0x209   : > { %v1317_v20 = vadd.f32 %v1316_v56, %v3654_v29  ;;  %v1206_v9 = vadd.f32 %v1205_v23, %v3656_v13  ;;  %v1318_v55 = vpop.f32.mrb[22].mxu1  ;;  %1600 = vmatprep.subr.bf16.mxu1 %v1434_v22  ;;  %v1207_v34 = vpop.f32.mrb[23].mxu0  ;;  %1528 = vmatpush1.bf16.msra.mxu0 %v1431_v37  ;;  %v1383_v15 = vmax.f32 %v1202_v27, 0.0 }
 0x20a   : > { %v1319_v44 = vadd.f32 %v1318_v55, %v3656_v13  ;;  %v1208_v58 = vadd.f32 %v1207_v34, %v3656_v13  ;;  %v1320_v4 = vpop.f32.mrb[23].mxu1  ;;  %1601 = vmatpush1.bf16.msra.mxu1 %v1433_v25  ;;  %v1385_v62 = vmax.f32 %v1315_v19, 0.0  ;;  %v1384_v60 = vmax.f32 %v1204_v14, 0.0 }
 0x20b   : > { %v1387_v0 = vmax.f32 %v1206_v9, 0.0  ;;  %v1321_v8 = vadd.f32 %v1320_v4, %v3656_v13  ;;  %v1386_v3 = vmax.f32 %v1317_v20, 0.0 }
 0x20c   : > { %v1389_v41 = vmax.f32 %v1319_v44, 0.0  ;;  %v1388_v29 = vmax.f32 %v1208_v58, 0.0 }
 0x20d   : > { %v1435_v36 = vpack.c.bf16 %v1387_v0, %v1383_v15  ;;  %v1390_v46 = vmax.f32 %v1321_v8, 0.0 }
 0x20e   : > { %v1437_v21 = vpack.c.bf16 %v1389_v41, %v1385_v62  ;;  %v1436_v49 = vpack.c.bf16 %v1388_v29, %v1384_v60  ;;  %v1211_v24 = vpop.f32.mrb[24].mxu0 }
 0x20f   : > { %v1438_v63 = vpack.c.bf16 %v1390_v46, %v1386_v3  ;;  %v1212_v38 = vadd.f32 %v1211_v24, %v3658_v59  ;;  %v1324_v45 = vpop.f32.mrb[24].mxu1  ;;  %v1213_v57 = vpop.f32.mrb[25].mxu0  ;;  %v2948_v24 = vld [vmem:[%s3941_s4] sm:$0xff]  }
 0x210   : > { %v1325_v52 = vadd.f32 %v1324_v45, %v3658_v59  ;;  %v1214_v32 = vadd.f32 %v1213_v57, %v3658_v59  ;;  %v1326_v13 = vpop.f32.mrb[25].mxu1  ;;  %v1215_v30 = vpop.f32.mrb[26].mxu0  ;;  %1529 = vmatprep.subr.bf16.mxu0 %v1436_v49  ;;  %v2951_v45 = vld [vmem:[%s3941_s4 + $0x18] sm:$0xff]  }
 0x211   : > { %v1327_v42 = vadd.f32 %v1326_v13, %v3658_v59  ;;  %v1216_v11 = vadd.f32 %v1215_v30, %v3660_v50  ;;  %v1328_v16 = vpop.f32.mrb[26].mxu1  ;;  %1602 = vmatprep.subr.bf16.mxu1 %v1438_v63  ;;  %v1217_v31 = vpop.f32.mrb[27].mxu0  ;;  %1530 = vmatpush1.bf16.msra.mxu0 %v1435_v36  ;;  %v1391_v61 = vmax.f32 %v1212_v38, 0.0  ;;  %v2949_v63 = vld [vmem:[%s3941_s4 + $0x8] sm:$0xff]   ;;  %v2950_v38 = vld [vmem:[%s3941_s4 + $0x10] sm:$0xff]  }
 0x212   : > { %v1329_v54 = vadd.f32 %v1328_v16, %v3660_v50  ;;  %v1218_v26 = vadd.f32 %v1217_v31, %v3660_v50  ;;  %v1330_v17 = vpop.f32.mrb[27].mxu1  ;;  %1603 = vmatpush1.bf16.msra.mxu1 %v1437_v21  ;;  %v1393_v7 = vmax.f32 %v1325_v52, 0.0  ;;  %v1392_v51 = vmax.f32 %v1214_v32, 0.0  ;;  %v3974_v52 = vld [vmem:[#allocation6_spill] sm:$0xff] }
 0x213   : > { %v1395_v18 = vmax.f32 %v1216_v11, 0.0  ;;  %v1331_v43 = vadd.f32 %v1330_v17, %v3660_v50  ;;  %v1394_v37 = vmax.f32 %v1327_v42, 0.0 }
 0x214   : > { %v1397_v5 = vmax.f32 %v1329_v54, 0.0  ;;  %v1396_v59 = vmax.f32 %v1218_v26, 0.0  ;;  %v3975_v26 = vld [vmem:[#allocation7_spill] sm:$0xff] }
 0x215   : > { %v1439_v33 = vpack.c.bf16 %v1395_v18, %v1391_v61  ;;  %v1398_v25 = vmax.f32 %v1331_v43, 0.0 }
 0x216   : > { %v1441_v40 = vpack.c.bf16 %v1397_v5, %v1393_v7  ;;  %v1440_v10 = vpack.c.bf16 %v1396_v59, %v1392_v51  ;;  %v1221_v22 = vpop.f32.mrb[28].mxu0 }
 0x217   : > { %v1442_v27 = vpack.c.bf16 %v1398_v25, %v1394_v37  ;;  %v1222_v2 = vadd.f32 %v1221_v22, %v3662_v1  ;;  %v1334_v6 = vpop.f32.mrb[28].mxu1  ;;  %v1223_v19 = vpop.f32.mrb[29].mxu0 }
 0x218   : > { %v1335_v14 = vadd.f32 %v1334_v6, %v3662_v1  ;;  %v1224_v56 = vadd.f32 %v1223_v19, %v3662_v1  ;;  %v1336_v50 = vpop.f32.mrb[29].mxu1  ;;  %v1225_v23 = vpop.f32.mrb[30].mxu0  ;;  %1531 = vmatprep.subr.bf16.mxu0 %v1440_v10 }
 0x219   : > { %v1337_v20 = vadd.f32 %v1336_v50, %v3662_v1  ;;  %v1226_v9 = vadd.f32 %v1225_v23, %v3664_v39  ;;  %v1338_v55 = vpop.f32.mrb[30].mxu1  ;;  %1604 = vmatprep.subr.bf16.mxu1 %v1442_v27  ;;  %v1227_v34 = vpop.f32.mrb[31].mxu0  ;;  %1532 = vmatpush1.bf16.msra.mxu0 %v1439_v33  ;;  %v1399_v15 = vmax.f32 %v1222_v2, 0.0  ;;  %v3976_v50 = vld [vmem:[#allocation8_spill] sm:$0xff] }
 0x21a   : > { %v1339_v44 = vadd.f32 %v1338_v55, %v3664_v39  ;;  %v1228_v58 = vadd.f32 %v1227_v34, %v3664_v39  ;;  %v1340_v4 = vpop.f32.mrb[31].mxu1  ;;  %1605 = vmatpush1.bf16.msra.mxu1 %v1441_v40  ;;  %v1401_v62 = vmax.f32 %v1335_v14, 0.0  ;;  %v1400_v60 = vmax.f32 %v1224_v56, 0.0 }
 0x21b   : > { %v1403_v0 = vmax.f32 %v1226_v9, 0.0  ;;  %v1341_v8 = vadd.f32 %v1340_v4, %v3664_v39  ;;  %v1402_v29 = vmax.f32 %v1337_v20, 0.0  ;;  %v3973_v39 = vmov 0  }
 0x21c   : > { %v1405_v41 = vmax.f32 %v1339_v44, 0.0  ;;  %v1404_v1 = vmax.f32 %v1228_v58, 0.0 }
 0x21d   : > { %v1443_v3 = vpack.c.bf16 %v1403_v0, %v1399_v15  ;;  %v1406_v36 = vmax.f32 %v1341_v8, 0.0  ;;  %v3977_v15 = vld [vmem:[#allocation9_spill] sm:$0xff] }
 0x21e   : > { %v1445_v46 = vpack.c.bf16 %v1405_v41, %v1401_v62  ;;  %v1444_v21 = vpack.c.bf16 %v1404_v1, %v1400_v60 }
 0x21f   : > { %v1446_v49 = vpack.c.bf16 %v1406_v36, %v1402_v29 }
 0x220   : > { %1533 = vmatprep.subr.bf16.mxu0 %v1444_v21 }
 0x221   : > { %1606 = vmatprep.subr.bf16.mxu1 %v1446_v49  ;;  %1534 = vmatpush1.bf16.msra.mxu0 %v1443_v3 }
 0x222   : > { %1607 = vmatpush1.bf16.msra.mxu1 %v1445_v46 }
 0x224   : > { %1552 = vmatmul.mubr.bf16.vlgmr.msra.gmra.mrb[32].mxu0 %v2948_v24 }
 0x225   : > { %1625 = vmatmul.mubr.bf16.vlgmr.msra.gmra.mrb[32].mxu1 %v2948_v24  ;;  %1561 = vmatprep.mubr.bf16.mxu0 %v3973_v39 }
 0x226   : > { %1634 = vmatprep.mubr.bf16.mxu1 %v3973_v39 }
 0x22c   : > { %1562 = vmatmul.mubr.bf16.gmra.mrb[36].mxu0 %v2949_v63 }
 0x22d   : > { %1635 = vmatmul.mubr.bf16.gmra.mrb[36].mxu1 %v2949_v63  ;;  %1571 = vmatprep.mubr.bf16.mxu0 %v3973_v39 }
 0x22e   : > { %1644 = vmatprep.mubr.bf16.mxu1 %v3973_v39 }
 0x234   : > { %1572 = vmatmul.mubr.bf16.gmra.mrb[40].mxu0 %v2950_v38 }
 0x235   : > { %1645 = vmatmul.mubr.bf16.gmra.mrb[40].mxu1 %v2950_v38  ;;  %1581 = vmatprep.mubr.bf16.mxu0 %v3973_v39 }
 0x236   : > { %1654 = vmatprep.mubr.bf16.mxu1 %v3973_v39 }
 0x23c   : > { %1582 = vmatmul.mubr.bf16.gmra.mrb[44].mxu0 %v2951_v45 }
 0x23d   : > { %1655 = vmatmul.mubr.bf16.gmra.mrb[44].mxu1 %v2951_v45  ;;  %1790 = vmatprep.mubr.bf16.mxu0 %v3973_v39 }
 0x23e   : > { %1843 = vmatprep.mubr.bf16.mxu1 %v3973_v39 }
 0x2f7   : > { %v1553_v57 = vpop.f32.mrb[32].mxu0 }
 0x2f8   : > { %v1554_v32 = vadd.f32 %v1553_v57, %v3974_v52  ;;  %v1626_v13 = vpop.f32.mrb[32].mxu1  ;;  %v1555_v30 = vpop.f32.mrb[33].mxu0 }
 0x2f9   : > { %v1627_v42 = vadd.f32 %v1626_v13, %v3974_v52  ;;  %v1556_v11 = vadd.f32 %v1555_v30, %v3974_v52  ;;  %v1628_v16 = vpop.f32.mrb[33].mxu1  ;;  %v1557_v31 = vpop.f32.mrb[34].mxu0  ;;  %v3978_v30 = vld [vmem:[#allocation10_spill] sm:$0xff] }
 0x2fa   : > { %v1629_v54 = vadd.f32 %v1628_v16, %v3974_v52  ;;  %v1558_v17 = vadd.f32 %v1557_v31, %v3975_v26  ;;  %v1630_v61 = vpop.f32.mrb[34].mxu1  ;;  %v1559_v18 = vpop.f32.mrb[35].mxu0  ;;  %v1665_v5 = vmax.f32 %v1554_v32, 0.0 }
 0x2fb   : > { %v1631_v43 = vadd.f32 %v1630_v61, %v3975_v26  ;;  %v1560_v7 = vadd.f32 %v1559_v18, %v3975_v26  ;;  %v1632_v51 = vpop.f32.mrb[35].mxu1  ;;  %v1667_v33 = vmax.f32 %v1627_v42, 0.0  ;;  %v1666_v25 = vmax.f32 %v1556_v11, 0.0  ;;  %v3979_v18 = vld [vmem:[#allocation11_spill] sm:$0xff] }
 0x2fc   : > { %v1669_v59 = vmax.f32 %v1558_v17, 0.0  ;;  %v1633_v37 = vadd.f32 %v1632_v51, %v3975_v26  ;;  %v1668_v22 = vmax.f32 %v1629_v54, 0.0 }
 0x2fd   : > { %v1671_v40 = vmax.f32 %v1631_v43, 0.0  ;;  %v1670_v10 = vmax.f32 %v1560_v7, 0.0 }
 0x2fe   : > { %v1701_v27 = vpack.c.bf16 %v1669_v59, %v1665_v5  ;;  %v1672_v2 = vmax.f32 %v1633_v37, 0.0 }
 0x2ff   : > { %v1703_v6 = vpack.c.bf16 %v1671_v40, %v1667_v33  ;;  %v1702_v19 = vpack.c.bf16 %v1670_v10, %v1666_v25  ;;  %v1563_v14 = vpop.f32.mrb[36].mxu0 }
 0x300   : > { %v1704_v56 = vpack.c.bf16 %v1672_v2, %v1668_v22  ;;  %v1564_v23 = vadd.f32 %v1563_v14, %v3976_v50  ;;  %v1636_v20 = vpop.f32.mrb[36].mxu1  ;;  %v1565_v9 = vpop.f32.mrb[37].mxu0 }
 0x301   : > { %v1637_v55 = vadd.f32 %v1636_v20, %v3976_v50  ;;  %v1566_v34 = vadd.f32 %v1565_v9, %v3976_v50  ;;  %v1638_v44 = vpop.f32.mrb[37].mxu1  ;;  %v1567_v58 = vpop.f32.mrb[38].mxu0  ;;  %1758 = vmatprep.subr.bf16.mxu0 %v1702_v19  ;;  %v3980_v9 = vld [vmem:[#allocation12_spill] sm:$0xff] }
 0x302   : > { %v1639_v4 = vadd.f32 %v1638_v44, %v3976_v50  ;;  %v1568_v0 = vadd.f32 %v1567_v58, %v3977_v15  ;;  %v1640_v8 = vpop.f32.mrb[38].mxu1  ;;  %1811 = vmatprep.subr.bf16.mxu1 %v1704_v56  ;;  %v1569_v62 = vpop.f32.mrb[39].mxu0  ;;  %1759 = vmatpush1.bf16.msra.mxu0 %v1701_v27  ;;  %v1673_v29 = vmax.f32 %v1564_v23, 0.0 }
 0x303   : > { %v1641_v60 = vadd.f32 %v1640_v8, %v3977_v15  ;;  %v1570_v41 = vadd.f32 %v1569_v62, %v3977_v15  ;;  %v1642_v1 = vpop.f32.mrb[39].mxu1  ;;  %1812 = vmatpush1.bf16.msra.mxu1 %v1703_v6  ;;  %v1675_v46 = vmax.f32 %v1637_v55, 0.0  ;;  %v1674_v21 = vmax.f32 %v1566_v34, 0.0  ;;  %v3981_v62 = vld [vmem:[#allocation13_spill] sm:$0xff] }
 0x304   : > { %v1677_v3 = vmax.f32 %v1568_v0, 0.0  ;;  %v1643_v36 = vadd.f32 %v1642_v1, %v3977_v15  ;;  %v1676_v63 = vmax.f32 %v1639_v4, 0.0 }
 0x305   : > { %v1679_v49 = vmax.f32 %v1641_v60, 0.0  ;;  %v1678_v24 = vmax.f32 %v1570_v41, 0.0 }
 0x306   : > { %v1705_v38 = vpack.c.bf16 %v1677_v3, %v1673_v29  ;;  %v1680_v45 = vmax.f32 %v1643_v36, 0.0 }
 0x307   : > { %v1707_v57 = vpack.c.bf16 %v1679_v49, %v1675_v46  ;;  %v1706_v52 = vpack.c.bf16 %v1678_v24, %v1674_v21  ;;  %v1573_v32 = vpop.f32.mrb[40].mxu0 }
 0x308   : > { %v1708_v13 = vpack.c.bf16 %v1680_v45, %v1676_v63  ;;  %v1574_v42 = vadd.f32 %v1573_v32, %v3978_v30  ;;  %v1646_v11 = vpop.f32.mrb[40].mxu1  ;;  %v1575_v16 = vpop.f32.mrb[41].mxu0 }
 0x309   : > { %v1647_v31 = vadd.f32 %v1646_v11, %v3978_v30  ;;  %v1576_v54 = vadd.f32 %v1575_v16, %v3978_v30  ;;  %v1648_v26 = vpop.f32.mrb[41].mxu1  ;;  %v1577_v17 = vpop.f32.mrb[42].mxu0  ;;  %1760 = vmatprep.subr.bf16.mxu0 %v1706_v52  ;;  %v2952_v11 = vld [vmem:[%s3943_s6] sm:$0xff]   ;;  %v2953_v16 = vld [vmem:[%s3943_s6 + $0x8] sm:$0xff]  }
 0x30a   : > { %v1649_v61 = vadd.f32 %v1648_v26, %v3978_v30  ;;  %v1578_v43 = vadd.f32 %v1577_v17, %v3979_v18  ;;  %v1650_v7 = vpop.f32.mrb[42].mxu1  ;;  %1813 = vmatprep.subr.bf16.mxu1 %v1708_v13  ;;  %v1579_v51 = vpop.f32.mrb[43].mxu0  ;;  %1761 = vmatpush1.bf16.msra.mxu0 %v1705_v38  ;;  %v1681_v33 = vmax.f32 %v1574_v42, 0.0 }
 0x30b   : > { %v1651_v5 = vadd.f32 %v1650_v7, %v3979_v18  ;;  %v1580_v59 = vadd.f32 %v1579_v51, %v3979_v18  ;;  %v1652_v37 = vpop.f32.mrb[43].mxu1  ;;  %1814 = vmatpush1.bf16.msra.mxu1 %v1707_v57  ;;  %v1683_v10 = vmax.f32 %v1647_v31, 0.0  ;;  %v1682_v22 = vmax.f32 %v1576_v54, 0.0  ;;  %v1729_v31 = vpop.permute.xlu1 %1728 }
 0x30c   : > { %v1685_v25 = vmax.f32 %v1578_v43, 0.0  ;;  %v1653_v40 = vadd.f32 %v1652_v37, %v3979_v18  ;;  %v1684_v6 = vmax.f32 %v1649_v61, 0.0  ;;  %v2075_v18 = vrot.slane %v3718_v12, 4 }
 0x30d   : > { %v1687_v27 = vmax.f32 %v1651_v5, 0.0  ;;  %v1686_v2 = vmax.f32 %v1580_v59, 0.0  ;;  %v2101_v5 = vrot.slane %v3722_v28, 4 }
 0x30e   : > { %v1709_v19 = vpack.c.bf16 %v1685_v25, %v1681_v33  ;;  %v1688_v14 = vmax.f32 %v1653_v40, 0.0  ;;  %v2114_v40 = vrot.slane %v3724_v48, 4 }
 0x30f   : > { %v1711_v56 = vpack.c.bf16 %v1687_v27, %v1683_v10  ;;  %v1710_v50 = vpack.c.bf16 %v1686_v2, %v1682_v22  ;;  %v1583_v23 = vpop.f32.mrb[44].mxu0  ;;  %v1734_v54 = vpop.permute.xlu1 %1733 }
 0x310   : > { %v1712_v20 = vpack.c.bf16 %v1688_v14, %v1684_v6  ;;  %v1584_v55 = vadd.f32 %v1583_v23, %v3980_v9  ;;  %v1656_v34 = vpop.f32.mrb[44].mxu1  ;;  %v1585_v44 = vpop.f32.mrb[45].mxu0 }
 0x311   : > { %v1657_v58 = vadd.f32 %v1656_v34, %v3980_v9  ;;  %v1586_v4 = vadd.f32 %v1585_v44, %v3980_v9  ;;  %v1658_v15 = vpop.f32.mrb[45].mxu1  ;;  %v1587_v0 = vpop.f32.mrb[46].mxu0  ;;  %1762 = vmatprep.subr.bf16.mxu0 %v1710_v50 }
 0x312   : > { %v1659_v8 = vadd.f32 %v1658_v15, %v3980_v9  ;;  %v1588_v60 = vadd.f32 %v1587_v0, %v3981_v62  ;;  %v1660_v41 = vpop.f32.mrb[46].mxu1  ;;  %1815 = vmatprep.subr.bf16.mxu1 %v1712_v20  ;;  %v1589_v1 = vpop.f32.mrb[47].mxu0  ;;  %1763 = vmatpush1.bf16.msra.mxu0 %v1709_v19  ;;  %v1689_v46 = vmax.f32 %v1584_v55, 0.0  ;;  %v3861_v20 = vadd.f32 %v2075_v18, %v3718_v12 }
 0x313   : > { %v1661_v29 = vadd.f32 %v1660_v41, %v3981_v62  ;;  %v1590_v3 = vadd.f32 %v1589_v1, %v3981_v62  ;;  %v1662_v36 = vpop.f32.mrb[47].mxu1  ;;  %1816 = vmatpush1.bf16.msra.mxu1 %v1711_v56  ;;  %v1691_v24 = vmax.f32 %v1657_v58, 0.0  ;;  %v1690_v63 = vmax.f32 %v1586_v4, 0.0  ;;  %v3850_v26 = vpop.permute.xlu1 %1738 }
 0x314   : > { %v1693_v21 = vmax.f32 %v1588_v60, 0.0  ;;  %v1663_v49 = vadd.f32 %v1662_v36, %v3981_v62  ;;  %v1692_v57 = vmax.f32 %v1659_v8, 0.0  ;;  %v3867_v58 = vadd.f32 %v2101_v5, %v3722_v28 }
 0x315   : > { %v1695_v38 = vmax.f32 %v1661_v29, 0.0  ;;  %v1694_v45 = vmax.f32 %v1590_v3, 0.0  ;;  %v3870_v15 = vadd.f32 %v2114_v40, %v3724_v48 }
 0x316   : > { %v1713_v52 = vpack.c.bf16 %v1693_v21, %v1689_v46  ;;  %v1696_v32 = vmax.f32 %v1663_v49, 0.0 }
 0x317   : > { %v1715_v13 = vpack.c.bf16 %v1695_v38, %v1691_v24  ;;  %v1714_v30 = vpack.c.bf16 %v1694_v45, %v1690_v63  ;;  %v1924_v17 = vpop.permute.xlu1 %1923 }
 0x318   : > { %v1716_v42 = vpack.c.bf16 %v1696_v32, %v1692_v57 }
 0x319   : > { %1764 = vmatprep.subr.bf16.mxu0 %v1714_v30 }
 0x31a   : > { %1817 = vmatprep.subr.bf16.mxu1 %v1716_v42  ;;  %1765 = vmatpush1.bf16.msra.mxu0 %v1713_v52 }
 0x31b   : > { %1818 = vmatpush1.bf16.msra.mxu1 %v1715_v13  ;;  %v1929_v12 = vpop.permute.xlu1 %1928 }
 0x31d   : > { %2281 = vmatmul.mubr.msk.bf16.vlgmr.msra.gmra.mrb[48].mxu0 %vm1751_vm0, %v2952_v11 }
 0x31e   : > { %2283 = vmatmul.mubr.msk.bf16.vlgmr.msra.gmra.mrb[48].mxu1 %vm1751_vm0, %v2952_v11  ;;  %1800 = vmatprep.mubr.bf16.mxu0 %v3973_v39 }
 0x31f   : > { %1853 = vmatprep.mubr.bf16.mxu1 %v3973_v39  ;;  %v2088_v39 = vrot.slane %v3720_v47, 4 }
 0x321   : > { %v3864_v44 = vadd.f32 %v2088_v39, %v3720_v47  ;;  %v1934_v39 = vpop.permute.xlu1 %1933 }
 0x325   : > { %2282 = vmatmul.mubr.msk.bf16.gmra.mrb[52].mxu0 %vm1751_vm0, %v2953_v16 }
 0x326   : > { %2284 = vmatmul.mubr.msk.bf16.gmra.mrb[52].mxu1 %vm1751_vm0, %v2953_v16 }
 0x3f0   : > { %v1792_v61 = vpop.f32.mrb[48].mxu0 }
 0x3f1   : > { %v1793_v43 = vadd.f32 %v1792_v61, %v3694_v35  ;;  %v1845_v7 = vpop.f32.mrb[48].mxu1  ;;  %v1794_v51 = vpop.f32.mrb[49].mxu0 }
 0x3f2   : > { %v1846_v59 = vadd.f32 %v1845_v7, %v3694_v35  ;;  %v1795_v37 = vadd.f32 %v1794_v51, %v3694_v35  ;;  %v1847_v33 = vpop.f32.mrb[49].mxu1  ;;  %v1796_v25 = vpop.f32.mrb[50].mxu0 }
 0x3f3   : > { %v1864_v10 = vmax.f32 %v1793_v43, 0.0  ;;  %v1848_v22 = vadd.f32 %v1847_v33, %v3694_v35  ;;  %v1797_v27 = vadd.f32 %v1796_v25, %v1729_v31  ;;  %v1849_v2 = vpop.f32.mrb[50].mxu1  ;;  %v1798_v6 = vpop.f32.mrb[51].mxu0 }
 0x3f4   : > { %v1866_v19 = vmax.f32 %v1846_v59, 0.0  ;;  %v1865_v14 = vmax.f32 %v1795_v37, 0.0  ;;  %v1850_v56 = vadd.f32 %v1849_v2, %v1729_v31  ;;  %v1799_v50 = vadd.f32 %v1798_v6, %v1729_v31  ;;  %v1851_v23 = vpop.f32.mrb[51].mxu1 }
 0x3f5   : > { %v1867_v9 = vmax.f32 %v1848_v22, 0.0  ;;  %v1868_v55 = vmax.f32 %v1797_v27, 0.0  ;;  %v1852_v34 = vadd.f32 %v1851_v23, %v1729_v31  ;;  %v1936_v0 = vmul.f32 %v3704_v53, %v1864_v10 }
 0x3f6   : > { %v1870_v35 = vmax.f32 %v1850_v56, 0.0  ;;  %v1869_v4 = vmax.f32 %v1799_v50, 0.0  ;;  %v1938_v60 = vmul.f32 %v3704_v53, %v1866_v19  ;;  %v1937_v41 = vmul.f32 %v3704_v53, %v1865_v14 }
 0x3f7   : > { %v1940_v8 = vmul.f32 %v1924_v17, %v1868_v55  ;;  %v1871_v62 = vmax.f32 %v1852_v34, 0.0  ;;  %v1939_v28 = vmul.f32 %v3704_v53, %v1867_v9  ;;  %v2077_v19 = vrot.slane %v3861_v20, 2 }
 0x3f8   : > { %v1942_v1 = vmul.f32 %v1924_v17, %v1870_v35  ;;  %v1941_v47 = vmul.f32 %v1924_v17, %v1869_v4  ;;  %v1802_v29 = vpop.f32.mrb[52].mxu0  ;;  %v2103_v23 = vrot.slane %v3867_v58, 2  ;;  %v2116_v34 = vrot.slane %v3870_v15, 2 }
 0x3f9   : > { %v1952_v3 = vadd.f32 %v1940_v8, %v1936_v0  ;;  %v1943_v36 = vmul.f32 %v1924_v17, %v1871_v62  ;;  %v1803_v46 = vadd.f32 %v1802_v29, %v1734_v54  ;;  %v1855_v21 = vpop.f32.mrb[52].mxu1  ;;  %v1804_v48 = vpop.f32.mrb[53].mxu0  ;;  %v2130_v35 = vlaneseq }
 0x3fa   : > { %v1970_v49 = vadd.f32 %v1942_v1, %v1938_v60  ;;  %v1961_v24 = vadd.f32 %v1941_v47, %v1937_v41  ;;  %v1856_v63 = vadd.f32 %v1855_v21, %v1734_v54  ;;  %v1805_v38 = vadd.f32 %v1804_v48, %v1734_v54  ;;  %v1857_v45 = vpop.f32.mrb[53].mxu1  ;;  %v1806_v57 = vpop.f32.mrb[54].mxu0 }
 0x3fb   : > { %v1979_v52 = vadd.f32 %v1943_v36, %v1939_v28  ;;  %v1872_v32 = vmax.f32 %v1803_v46, 0.0  ;;  %v1858_v13 = vadd.f32 %v1857_v45, %v1734_v54  ;;  %v1807_v30 = vadd.f32 %v1806_v57, %v3850_v26  ;;  %v1859_v42 = vpop.f32.mrb[54].mxu1  ;;  %v1808_v11 = vpop.f32.mrb[55].mxu0 }
 0x3fc   : > { %v1874_v16 = vmax.f32 %v1856_v63, 0.0  ;;  %v1873_v53 = vmax.f32 %v1805_v38, 0.0  ;;  %v1860_v31 = vadd.f32 %v1859_v42, %v3850_v26  ;;  %v1809_v17 = vadd.f32 %v1808_v11, %v3850_v26  ;;  %v1861_v61 = vpop.f32.mrb[55].mxu1 }
 0x3fd   : > { %v1944_v18 = vmul.f32 %v1929_v12, %v1872_v32  ;;  %v1875_v43 = vmax.f32 %v1858_v13, 0.0  ;;  %v1876_v7 = vmax.f32 %v1807_v30, 0.0  ;;  %v1862_v51 = vadd.f32 %v1861_v61, %v3850_v26 }
 0x3fe   : > { %v1946_v5 = vmul.f32 %v1929_v12, %v1874_v16  ;;  %v1945_v59 = vmul.f32 %v1929_v12, %v1873_v53  ;;  %v1878_v54 = vmax.f32 %v1860_v31, 0.0  ;;  %v1877_v37 = vmax.f32 %v1809_v17, 0.0 }
 0x3ff   : > { %v1953_v33 = vadd.f32 %v1952_v3, %v1944_v18  ;;  %v1947_v25 = vmul.f32 %v1929_v12, %v1875_v43  ;;  %v1948_v40 = vmul.f32 %v1934_v39, %v1876_v7  ;;  %v1879_v10 = vmax.f32 %v1862_v51, 0.0 }
 0x400   : > { %v1971_v22 = vadd.f32 %v1970_v49, %v1946_v5  ;;  %v1962_v27 = vadd.f32 %v1961_v24, %v1945_v59  ;;  %v1950_v2 = vmul.f32 %v1934_v39, %v1878_v54  ;;  %v1949_v6 = vmul.f32 %v1934_v39, %v1877_v37 }
 0x401   : > { %v1980_v14 = vadd.f32 %v1979_v52, %v1947_v25  ;;  %v1954_v56 = vadd.f32 %v1953_v33, %v1948_v40  ;;  %v1951_v50 = vmul.f32 %v1934_v39, %v1879_v10  ;;  %v2090_v26 = vrot.slane %v3864_v44, 2 }
 0x402   : > { %v1972_v9 = vadd.f32 %v1971_v22, %v1950_v2  ;;  %v1963_v55 = vadd.f32 %v1962_v27, %v1949_v6  ;;  %v2078_v12 = vadd.f32 %v2077_v19, %v3861_v20  ;;  %v2104_v47 = vadd.f32 %v2103_v23, %v3867_v58 }
 0x403   : > { %v1955_v4 = vrot.slane %v1954_v56, 4  ;;  %v1981_v0 = vadd.f32 %v1980_v14, %v1951_v50  ;;  %v2091_v1 = vadd.f32 %v2090_v26, %v3864_v44  ;;  %v2117_v3 = vadd.f32 %v2116_v34, %v3870_v15  ;;  %v2128_v15 = vpop.permute.xlu1 %2127 }
 0x404   : > { %v1973_v8 = vrot.slane %v1972_v9, 4  ;;  %v1964_v62 = vrot.slane %v1963_v55, 4  ;;  %v2131_v36 = vshrl.u32 %v2130_v35, 7  ;;  %v2079_v24 = vrot.slane %v2078_v12, 1 }
 0x405   : > { %v1956_v60 = vadd.f32 %v1955_v4, %v1954_v56  ;;  %v1982_v41 = vrot.slane %v1981_v0, 4  ;;  %v3019_v63 = vmov 1966171168   ;;  %v2092_v57 = vrot.slane %v2091_v1, 1 }
 0x406   : > { %v1974_v29 = vadd.f32 %v1973_v8, %v1972_v9  ;;  %v1965_v28 = vadd.f32 %v1964_v62, %v1963_v55  ;;  %v2145_v38 = vunpack.c.l.s4 %v3019_v63  ;;  %v2105_v52 = vrot.slane %v2104_v47, 1 }
 0x407   : > { %v1957_v46 = vrot.slane %v1956_v60, 2  ;;  %v1983_v21 = vadd.f32 %v1982_v41, %v1981_v0  ;;  %v2118_v58 = vrot.slane %v2117_v3, 1  ;;  %v2132_v13 = vsub.s32 0, %v2131_v36 }
 0x408   : > { %v1975_v48 = vrot.slane %v1974_v29, 2  ;;  %v1966_v49 = vrot.slane %v1965_v28, 2  ;;  %v2080_v53 = vadd.f32 %v2079_v24, %v2078_v12  ;;  %v2146_v31 = vunpack.c.0.s8 %v2145_v38 }
 0x409   : > { %v1958_v20 = vadd.f32 %v1957_v46, %v1956_v60  ;;  %v1984_v45 = vrot.slane %v1983_v21, 2  ;;  %v2093_v18 = vadd.f32 %v2092_v57, %v2091_v1  ;;  %v2106_v43 = vadd.f32 %v2105_v52, %v2104_v47 }
 0x40a   : > { %v1976_v44 = vadd.f32 %v1975_v48, %v1974_v29  ;;  %v1967_v32 = vadd.f32 %v1966_v49, %v1965_v28  ;;  %v2119_v39 = vadd.f32 %v2118_v58, %v2117_v3  ;;  %v2133_v5 = vrot.slane %v2128_v15, %v2132_v13 }
 0x40b   : > { %v1959_v30 = vrot.slane %v1958_v20, 1  ;;  %v1985_v42 = vadd.f32 %v1984_v45, %v1983_v21  ;;  %v2149_v10 = vsub.s32 %v2146_v31, %v2131_v36  ;;  %vm2169_vm1 = vcmp.lt.s32.totalorder %v2130_v35, 512 }
 0x40c   : > { %v1977_v11 = vrot.slane %v1976_v44, 1  ;;  %v1968_v16 = vrot.slane %v1967_v32, 1 }
 0x40d   : > { %v1960_v17 = vadd.f32 %v1959_v30, %v1958_v20  ;;  %v1986_v61 = vrot.slane %v1985_v42, 1 }
 0x40e   : > { %v1978_v7 = vadd.f32 %v1977_v11, %v1976_v44  ;;  %v1969_v51 = vadd.f32 %v1968_v16, %v1967_v32 }
 0x40f   : > { %v2120_v59 = vadd.f32 %v2080_v53, %v1960_v17  ;;  %v1987_v54 = vadd.f32 %v1986_v61, %v1985_v42 }
 0x410   : > { %v2122_v37 = vadd.f32 %v2106_v43, %v1978_v7  ;;  %v2121_v33 = vadd.f32 %v2093_v18, %v1969_v51 }
 0x411   : > { %v2134_v25 = vadd.f32 %v2133_v5, %v2120_v59  ;;  %v2123_v40 = vadd.f32 %v2119_v39, %v1987_v54 }
 0x412   : > { %v2136_v22 = vadd.f32 %v2133_v5, %v2122_v37  ;;  %v2135_v27 = vadd.f32 %v2133_v5, %v2121_v33 }
 0x413   : > { %v2137_v2 = vadd.f32 %v2133_v5, %v2123_v40 }
 0x414   : > { %v2142_v6 = vcombine.low %v2134_v25, %v2135_v27 }
 0x415   : > { %v2143_v19 = vcombine.low %v2136_v22, %v2137_v2 }
 0x416   : > { %v2150_v14 = vrot.slane %v2142_v6, %v2149_v10 }
 0x417   : > { %v2157_v56 = vrot.slane %v2143_v19, %v2149_v10 }
 0x419   : > { %v2158_v50 = vcombine.low %v2150_v14, %v2157_v56 }
 0x41b   : > { %v2165_v26 = vrot.slane %v2158_v50, %v2149_v10 }
 0x41d   : > { %2171 = vst.msk [vmem:[%s398_s23] sm:$0xf] %vm2169_vm1, %v2165_v26 }
 0x41e   : > { %2967 = shalt.err (!%p2964_p3)
}
 0x41f   : > { %s2968_s30 = scalar_lea.hbm %s3895_s13, 64  ;;  %s2972_s26 = scalar_lea.hbm %s3948_s11, 128 }
 0x420   : > { %p2969_p4 = scmp.ne.s32.totalorder %s3895_s13, %s2968_s30  ;;  %p2973_p9 = scmp.lt.u32.totalorder %s3895_s13, %s3948_s11 }
 0x421   : > { %p2974_p10 = scmp.lt.u32.totalorder %s2972_s26, %s2968_s30  ;;  %p2976_p12 = scmp.lt.u32.totalorder %s2968_s30, %s3895_s13 }
 0x422   : > { %p2970_p7 = pnand %p2969_p4, %p3119_p5 }
 0x423   : > { %p2975_p11 = por %p2974_p10, %p2973_p9 }
 0x424   : > { %p2971_p8 = pneg %p2970_p7 }
 0x425   : > { %p2977_p13 = por %p2976_p12, %p2975_p11 }
 0x427   : > { %p2978_p0 = pnand %p2977_p13, %p2971_p8 }
 0x429   : > { %2981 = shalt.err (!%p2978_p0)
}
 0x42a   : > { %2609 = dma.vmem_to_hbm [thread:$0]  (%p3119_p5), %s3897_s25, 64, %s3895_s13, %s2173_s14  }
 0x42b PF: > { %p2615_p1 = scmp.ge.s32.totalorder %s3016_s22, 2  ;;  %s2199_s15 = sand.u32 1, %s3004_s19  }
 0x42c   : > { %s2200_s17 = scalar_lea.sflag [#allocation4], %s2199_s15 }
 0x42d   : > { %p2612_p2 = pnand %p2615_p1, %p3123_p6 }
 0x42f   : > { %2999 = dma.done.wait (!%p2612_p2), %s2200_s17, 64  }
 0x430   : > { %3001 = vsyncadd (!%p2612_p2), %s2200_s17, 4294967232  ;;  %p23_p3 = scmp.ge.s32.totalorder %s3107_s24, 4   ;;  %s3982_s19 = smov %s3008_s20 }
 0x431   : > { %s3983_s20 = smov %s3012_s21  ;;  %s3984_s21 = smov %s3117_s27 }
 0x432   : > { %s3985_s22 = smov %s3107_s24  ;;  %25 = sbr.rel (!%p23_p3) target bundleno = 6 (0x6), region = 102 }
 0x439   :  { %2205 = vsyncpa [#allocation4], 1 }
 0x43a   :  { %2207 = vsyncpa [#allocation4 + $0x1], 1 }

</bundles_post_ra>
